<compile_context>
chip_gen: v5e
topology: v5e:2x2
jax: 0.10.0
libtpu: 0.0.40
codegen_flags: <defaults>
</compile_context>

<pallas_src>
import math
from functools import partial

import jax
import jax.numpy as jnp
from jax.experimental import pallas as pl
from jax.experimental.pallas import tpu as pltpu


def _round_up(x, m):
    return (x + m - 1) // m * m


# ---------------------------------------------------------------------------
# Linear: x @ W + b (optional ReLU), tiled over rows and output columns.
# ---------------------------------------------------------------------------
def _linear_kernel(x_ref, w_ref, b_ref, o_ref, *, relu):
    y = jnp.dot(x_ref[...], w_ref[...], preferred_element_type=jnp.float32)
    y = y + b_ref[...]
    if relu:
        y = jnp.maximum(y, 0.0)
    o_ref[...] = y.astype(o_ref.dtype)


def linear(x, w, b, *, relu=False, row_tile=256, col_tile=512):
    din, dout = w.shape
    lead = x.shape[:-1]
    n = int(math.prod(lead)) if lead else 1

    din_pad = _round_up(din, 128)
    tm = min(row_tile, _round_up(n, 8))
    n_pad = _round_up(n, tm)
    tn = min(col_tile, _round_up(dout, 128))
    dout_pad = _round_up(_round_up(dout, 128), tn)

    x2d = jnp.pad(x.reshape(n, din), ((0, n_pad - n), (0, din_pad - din)))
    wp = jnp.pad(w, ((0, din_pad - din), (0, dout_pad - dout)))
    bp = jnp.pad(b, (0, dout_pad - dout)).reshape(1, dout_pad)

    out = pl.pallas_call(
        partial(_linear_kernel, relu=relu),
        out_shape=jax.ShapeDtypeStruct((n_pad, dout_pad), x.dtype),
        grid=(n_pad // tm, dout_pad // tn),
        in_specs=[
            pl.BlockSpec((tm, din_pad), lambda i, j: (i, 0)),
            pl.BlockSpec((din_pad, tn), lambda i, j: (0, j)),
            pl.BlockSpec((1, tn), lambda i, j: (0, j)),
        ],
        out_specs=pl.BlockSpec((tm, tn), lambda i, j: (i, j)),
        compiler_params=pltpu.CompilerParams(
            dimension_semantics=("parallel", "parallel")),
    )(x2d, wp, bp)
    return out[:n, :dout].reshape(*lead, dout)


# ---------------------------------------------------------------------------
# Fused FeedForward: linear1 -> ReLU -> (dropout = identity) -> linear2.
# Grid = (row tiles [parallel], dim_ff reduction tiles [arbitrary]);
# output stays VMEM-resident across the reduction axis via an f32 accumulator.
# ---------------------------------------------------------------------------
def _ffn_kernel(x_ref, w1_ref, b1_ref, w2_ref, b2_ref, o_ref, acc_ref):
    k = pl.program_id(1)

    @pl.when(k == 0)
    def _():
        acc_ref[...] = jnp.zeros_like(acc_ref)

    h = jnp.dot(x_ref[...], w1_ref[...], preferred_element_type=jnp.float32)
    h = jnp.maximum(h + b1_ref[...], 0.0)          # bias + ReLU stay in f32
    # dropout (eval mode) -> identity
    h = h if h.dtype == w2_ref.dtype else h.astype(w2_ref.dtype)
    acc_ref[...] += jnp.dot(h, w2_ref[...], preferred_element_type=jnp.float32)

    @pl.when(k == pl.num_programs(1) - 1)
    def _():
        o_ref[...] = (acc_ref[...] + b2_ref[...]).astype(o_ref.dtype)


def feed_forward(x, w1, b1, w2, b2, *, compute_dtype=None,
                 row_tile=256, ff_tile=512, vmem_limit_bytes=32 * 1024 * 1024):
    d_model = x.shape[-1]
    dim_ff = w1.shape[1]
    lead = x.shape[:-1]
    n = int(math.prod(lead)) if lead else 1
    out_dtype = x.dtype
    cdt = jnp.dtype(compute_dtype) if compute_dtype is not None else x.dtype

    d_pad = _round_up(d_model, 128)
    tm = min(row_tile, _round_up(n, 8))
    n_pad = _round_up(n, tm)
    tf = min(ff_tile, _round_up(dim_ff, 128))
    ff_pad = _round_up(dim_ff, tf)

    # Zero padding is exact: padded ff columns give h = relu(0 + 0) = 0 and the
    # matching padded w2 rows are zero; padded rows / d_model cols are sliced off.
    x2d = jnp.pad(x.reshape(n, d_model).astype(cdt),
                  ((0, n_pad - n), (0, d_pad - d_model)))
    w1p = jnp.pad(w1.astype(cdt), ((0, d_pad - d_model), (0, ff_pad - dim_ff)))
    w2p = jnp.pad(w2.astype(cdt), ((0, ff_pad - dim_ff), (0, d_pad - d_model)))
    b1p = jnp.pad(b1.astype(jnp.float32), (0, ff_pad - dim_ff)).reshape(1, ff_pad)
    b2p = jnp.pad(b2.astype(jnp.float32), (0, d_pad - d_model)).reshape(1, d_pad)

    grid = (n_pad // tm, ff_pad // tf)
    itemsize = jnp.dtype(cdt).itemsize
    cost = pl.CostEstimate(
        flops=4 * n_pad * d_pad * ff_pad,
        transcendentals=0,
        bytes_accessed=(x2d.size + w1p.size + w2p.size) * itemsize
        + (b1p.size + b2p.size) * 4
        + n_pad * d_pad * jnp.dtype(out_dtype).itemsize,
    )

    out = pl.pallas_call(
        _ffn_kernel,
        out_shape=jax.ShapeDtypeStruct((n_pad, d_pad), out_dtype),
        grid_spec=pltpu.PrefetchScalarGridSpec(
            num_scalar_prefetch=0,
            grid=grid,
            in_specs=[
                pl.BlockSpec((tm, d_pad), lambda i, k: (i, 0)),   # x row tile
                pl.BlockSpec((d_pad, tf), lambda i, k: (0, k)),   # w1 column slab
                pl.BlockSpec((1, tf), lambda i, k: (0, k)),       # b1 slice
                pl.BlockSpec((tf, d_pad), lambda i, k: (k, 0)),   # w2 row slab
                pl.BlockSpec((1, d_pad), lambda i, k: (0, 0)),    # b2
            ],
            out_specs=pl.BlockSpec((tm, d_pad), lambda i, k: (i, 0)),
            scratch_shapes=[pltpu.VMEM((tm, d_pad), jnp.float32)],
        ),
        compiler_params=pltpu.CompilerParams(
            dimension_semantics=("parallel", "arbitrary"),
            vmem_limit_bytes=vmem_limit_bytes,
        ),
        cost_estimate=cost,
    )(x2d, w1p, b1p, w2p, b2p)

    return out[:n, :d_model].reshape(*lead, d_model)


# ---------------------------------------------------------------------------
# Scaled dot-product attention, one (batch, head) per grid step.
# ---------------------------------------------------------------------------
def _attn_kernel(q_ref, k_ref, v_ref, m_ref, o_ref, *, scale):
    q = q_ref[0]
    k = k_ref[0]
    v = v_ref[0]
    s = jax.lax.dot_general(q, k, (((1,), (1,)), ((), ())),
                            preferred_element_type=jnp.float32) * scale
    s = s + m_ref[...]
    s_max = jnp.max(s, axis=-1, keepdims=True)
    p = jnp.exp(s - s_max)
    denom = jnp.sum(p, axis=-1, keepdims=True)
    o = jnp.dot(p, v, preferred_element_type=jnp.float32)
    o_ref[0] = (o / denom).astype(o_ref.dtype)


def attention(q, k, v, mask):
    """q: (BH, Sq, dk), k/v: (BH, Sk, dk), mask: additive (Sq, Sk) or None."""
    bh, sq, dk = q.shape
    sk = k.shape[1]
    sq_pad = _round_up(sq, 8)
    sk_pad = _round_up(sk, 128)        # lane-dense score / prob tile
    dk_pad = _round_up(dk, 128)
    scale = 1.0 / math.sqrt(dk)

    qp = jnp.pad(q, ((0, 0), (0, sq_pad - sq), (0, dk_pad - dk)))
    kp = jnp.pad(k, ((0, 0), (0, sk_pad - sk), (0, dk_pad - dk)))
    vp = jnp.pad(v, ((0, 0), (0, sk_pad - sk), (0, dk_pad - dk)))

    if mask is None:
        mask = jnp.zeros((sq, sk), jnp.float32)
    mp = jnp.pad(mask.astype(jnp.float32), ((0, sq_pad - sq), (0, sk_pad - sk)))
    key_valid = (jnp.arange(sk_pad) < sk)[None, :]
    mp = jnp.where(key_valid, mp, -1e9)   # padded keys -> ~zero softmax weight

    out = pl.pallas_call(
        partial(_attn_kernel, scale=scale),
        out_shape=jax.ShapeDtypeStruct((bh, sq_pad, dk_pad), q.dtype),
        grid=(bh,),
        in_specs=[
            pl.BlockSpec((1, sq_pad, dk_pad), lambda b: (b, 0, 0)),
            pl.BlockSpec((1, sk_pad, dk_pad), lambda b: (b, 0, 0)),
            pl.BlockSpec((1, sk_pad, dk_pad), lambda b: (b, 0, 0)),
            pl.BlockSpec((sq_pad, sk_pad), lambda b: (0, 0)),
        ],
        out_specs=pl.BlockSpec((1, sq_pad, dk_pad), lambda b: (b, 0, 0)),
        compiler_params=pltpu.CompilerParams(dimension_semantics=("parallel",)),
    )(qp, kp, vp, mp)
    return out[:, :sq, :dk]


# ---------------------------------------------------------------------------
# Fused residual add + LayerNorm (lane mask excludes padded feature columns).
# ---------------------------------------------------------------------------
def _add_ln_kernel(x_ref, y_ref, g_ref, b_ref, o_ref, *, d, eps):
    s = x_ref[...] + y_ref[...]
    col = jax.lax.broadcasted_iota(jnp.int32, s.shape, 1)
    valid = col < d
    mean = jnp.sum(s, axis=-1, keepdims=True) * (1.0 / d)     # pads are zero
    diff = jnp.where(valid, s - mean, 0.0)
    var = jnp.sum(diff * diff, axis=-1, keepdims=True) * (1.0 / d)
    inv = jax.lax.rsqrt(var + eps)
    o_ref[...] = (diff * inv * g_ref[...] + b_ref[...]).astype(o_ref.dtype)


def add_layer_norm(x, y, gamma, beta, *, eps=1e-5, row_tile=512):
    d = x.shape[-1]
    lead = x.shape[:-1]
    n = int(math.prod(lead)) if lead else 1
    d_pad = _round_up(d, 128)
    tm = min(row_tile, _round_up(n, 8))
    n_pad = _round_up(n, tm)

    xp = jnp.pad(x.reshape(n, d), ((0, n_pad - n), (0, d_pad - d)))
    yp = jnp.pad(y.reshape(n, d), ((0, n_pad - n), (0, d_pad - d)))
    gp = jnp.pad(gamma, (0, d_pad - d)).reshape(1, d_pad)
    bp = jnp.pad(beta, (0, d_pad - d)).reshape(1, d_pad)

    out = pl.pallas_call(
        partial(_add_ln_kernel, d=d, eps=eps),
        out_shape=jax.ShapeDtypeStruct((n_pad, d_pad), x.dtype),
        grid=(n_pad // tm,),
        in_specs=[pl.BlockSpec((tm, d_pad), lambda i: (i, 0)),
                  pl.BlockSpec((tm, d_pad), lambda i: (i, 0)),
                  pl.BlockSpec((1, d_pad), lambda i: (0, 0)),
                  pl.BlockSpec((1, d_pad), lambda i: (0, 0))],
        out_specs=pl.BlockSpec((tm, d_pad), lambda i: (i, 0)),
        compiler_params=pltpu.CompilerParams(dimension_semantics=("parallel",)),
    )(xp, yp, gp, bp)
    return out[:n, :d].reshape(*lead, d)


# ---------------------------------------------------------------------------
# Token embedding scale + positional encoding add.
# ---------------------------------------------------------------------------
def _embed_pos_kernel(x_ref, p_ref, o_ref, *, scale):
    o_ref[...] = x_ref[...] * scale + p_ref[...]


def embed_and_position(tokens, emb_table, pos_emb, d_model):
    # TODO(synk): token-id gather stays a JAX take; no clean rectangular-BlockSpec gather.
    emb = jnp.take(emb_table, tokens, axis=0)              # (B, S, d_model)
    B, S, _ = emb.shape
    s_pad = _round_up(S, 8)
    d_pad = _round_up(d_model, 128)
    xp = jnp.pad(emb, ((0, 0), (0, s_pad - S), (0, d_pad - d_model)))
    pp = jnp.pad(pos_emb[:S], ((0, s_pad - S), (0, d_pad - d_model)))
    out = pl.pallas_call(
        partial(_embed_pos_kernel, scale=math.sqrt(d_model)),
        out_shape=jax.ShapeDtypeStruct((B, s_pad, d_pad), emb.dtype),
        grid=(B,),
        in_specs=[pl.BlockSpec((1, s_pad, d_pad), lambda b: (b, 0, 0)),
                  pl.BlockSpec((s_pad, d_pad), lambda b: (0, 0))],
        out_specs=pl.BlockSpec((1, s_pad, d_pad), lambda b: (b, 0, 0)),
        compiler_params=pltpu.CompilerParams(dimension_semantics=("parallel",)),
    )(xp, pp)
    return out[:, :S, :d_model]


# ---------------------------------------------------------------------------
# Model composition (Pallas path).
# ---------------------------------------------------------------------------
def multi_head_attention(x_q, x_kv, p, n_head, mask, *, self_attn):
    B, sq, d = x_q.shape
    sk = x_kv.shape[1]
    dk = d // n_head

    if self_attn:
        # Fused QKV projection: one lane-dense matmul instead of three narrow ones.
        w = jnp.concatenate([p['wq'], p['wk'], p['wv']], axis=1)
        bias = jnp.concatenate([p['bq'], p['bk'], p['bv']])
        qkv = linear(x_q, w, bias)
        q, k, v = qkv[..., :d], qkv[..., d:2 * d], qkv[..., 2 * d:]
    else:
        q = linear(x_q, p['wq'], p['bq'])
        kv = linear(x_kv, jnp.concatenate([p['wk'], p['wv']], axis=1),
                    jnp.concatenate([p['bk'], p['bv']]))
        k, v = kv[..., :d], kv[..., d:]

    def split_heads(t, s):
        return t.reshape(B, s, n_head, dk).transpose(0, 2, 1, 3).reshape(B * n_head, s, dk)

    o = attention(split_heads(q, sq), split_heads(k, sk), split_heads(v, sk), mask)
    o = o.reshape(B, n_head, sq, dk).transpose(0, 2, 1, 3).reshape(B, sq, d)
    return linear(o, p['wo'], p['bo'])


def encoder_layer(x, p, n_head, src_mask):
    a = multi_head_attention(x, x, p['attn'], n_head, src_mask, self_attn=True)
    x = add_layer_norm(x, a, p['ln1_g'], p['ln1_b'])
    f = feed_forward(x, p['w1'], p['b1'], p['w2'], p['b2'])
    x = add_layer_norm(x, f, p['ln2_g'], p['ln2_b'])
    return x


def decoder_layer(x, memory, p, n_head, tgt_mask):
    a = multi_head_attention(x, x, p['self_attn'], n_head, tgt_mask, self_attn=True)
    x = add_layer_norm(x, a, p['ln1_g'], p['ln1_b'])
    c = multi_head_attention(x, memory, p['cross_attn'], n_head, None, self_attn=False)
    x = add_layer_norm(x, c, p['ln2_g'], p['ln2_b'])
    f = feed_forward(x, p['w1'], p['b1'], p['w2'], p['b2'])
    x = add_layer_norm(x, f, p['ln3_g'], p['ln3_b'])
    return x


def transformer_forward(params, src, tgt, src_mask, tgt_mask, *, n_head, d_model):
    memory = embed_and_position(src, params['src_emb'], params['pos_emb'], d_model)
    for lp in params['encoder_layers']:
        memory = encoder_layer(memory, lp, n_head, src_mask)
    x = embed_and_position(tgt, params['tgt_emb'], params['pos_emb'], d_model)
    for lp in params['decoder_layers']:
        x = decoder_layer(x, memory, lp, n_head, tgt_mask)
    return linear(x, params['gen_w'], params['gen_b'])


# ---------------------------------------------------------------------------
# Deterministic parameter init (mimics nn.Linear / nn.Embedding defaults).
# ---------------------------------------------------------------------------
def init_linear(key, din, dout):
    k1, k2 = jax.random.split(key)
    bound = 1.0 / math.sqrt(din)
    w = jax.random.uniform(k1, (din, dout), jnp.float32, -bound, bound)
    b = jax.random.uniform(k2, (dout,), jnp.float32, -bound, bound)
    return w, b


def init_mha(key, d_model):
    p = {}
    for name, k in zip(('q', 'k', 'v', 'o'), jax.random.split(key, 4)):
        w, b = init_linear(k, d_model, d_model)
        p['w' + name], p['b' + name] = w, b
    return p


def _init_ln(key, d):
    k1, k2 = jax.random.split(key)
    return (1.0 + 0.1 * jax.random.normal(k1, (d,), jnp.float32),
            0.1 * jax.random.normal(k2, (d,), jnp.float32))


def init_encoder_layer(key, d_model, dim_ff):
    k_attn, k_f1, k_f2, k_ln1, k_ln2 = jax.random.split(key, 5)
    w1, b1 = init_linear(k_f1, d_model, dim_ff)
    w2, b2 = init_linear(k_f2, dim_ff, d_model)
    g1, beta1 = _init_ln(k_ln1, d_model)
    g2, beta2 = _init_ln(k_ln2, d_model)
    return dict(attn=init_mha(k_attn, d_model), w1=w1, b1=b1, w2=w2, b2=b2,
                ln1_g=g1, ln1_b=beta1, ln2_g=g2, ln2_b=beta2)


def init_decoder_layer(key, d_model, dim_ff):
    k_sa, k_ca, k_f1, k_f2, k_ln1, k_ln2, k_ln3 = jax.random.split(key, 7)
    w1, b1 = init_linear(k_f1, d_model, dim_ff)
    w2, b2 = init_linear(k_f2, dim_ff, d_model)
    g1, beta1 = _init_ln(k_ln1, d_model)
    g2, beta2 = _init_ln(k_ln2, d_model)
    g3, beta3 = _init_ln(k_ln3, d_model)
    return dict(self_attn=init_mha(k_sa, d_model), cross_attn=init_mha(k_ca, d_model),
                w1=w1, b1=b1, w2=w2, b2=b2,
                ln1_g=g1, ln1_b=beta1, ln2_g=g2, ln2_b=beta2, ln3_g=g3, ln3_b=beta3)


def init_transformer(key, *, n_enc, n_dec, d_model, dim_ff, src_vocab, tgt_vocab, max_len):
    keys = jax.random.split(key, 3 + n_enc + n_dec)
    src_emb = jax.random.normal(keys[0], (src_vocab, d_model), jnp.float32)
    tgt_emb = jax.random.normal(keys[1], (tgt_vocab, d_model), jnp.float32)
    gen_w, gen_b = init_linear(keys[2], d_model, tgt_vocab)
    enc = [init_encoder_layer(keys[3 + i], d_model, dim_ff) for i in range(n_enc)]
    dec = [init_decoder_layer(keys[3 + n_enc + i], d_model, dim_ff) for i in range(n_dec)]
    # Sinusoidal positional table (matches PositionalEncoding buffer).
    position = jnp.arange(max_len, dtype=jnp.float32)[:, None]
    div_term = jnp.exp(-jnp.arange(0, d_model, 2, dtype=jnp.float32)
                       * (math.log(10000.0) / d_model))
    pe = jnp.zeros((max_len, d_model), jnp.float32)
    pe = pe.at[:, 0::2].set(jnp.sin(position * div_term))
    pe = pe.at[:, 1::2].set(jnp.cos(position * div_term))
    return dict(src_emb=src_emb, tgt_emb=tgt_emb, pos_emb=pe,
                gen_w=gen_w, gen_b=gen_b, encoder_layers=enc, decoder_layers=dec)


# ---------------------------------------------------------------------------
# Pure-JAX reference (same params, eval-mode dropout).
# ---------------------------------------------------------------------------
def ref_linear(x, w, b):
    return x @ w + b


def ref_layer_norm(x, g, b, eps=1e-5):
    mu = jnp.mean(x, axis=-1, keepdims=True)
    var = jnp.mean((x - mu) ** 2, axis=-1, keepdims=True)
    return (x - mu) * jax.lax.rsqrt(var + eps) * g + b


def ref_mha(xq, xkv, p, n_head, mask):
    B, sq, d = xq.shape
    sk = xkv.shape[1]
    dk = d // n_head
    q = ref_linear(xq, p['wq'], p['bq']).reshape(B, sq, n_head, dk).transpose(0, 2, 1, 3)
    k = ref_linear(xkv, p['wk'], p['bk']).reshape(B, sk, n_head, dk).transpose(0, 2, 1, 3)
    v = ref_linear(xkv, p['wv'], p['bv']).reshape(B, sk, n_head, dk).transpose(0, 2, 1, 3)
    s = jnp.einsum('bhqd,bhkd->bhqk', q, k) / math.sqrt(dk)
    if mask is not None:
        s = s + mask
    a = jax.nn.softmax(s, axis=-1)
    o = jnp.einsum('bhqk,bhkd->bhqd', a, v).transpose(0, 2, 1, 3).reshape(B, sq, d)
    return ref_linear(o, p['wo'], p['bo'])


def ffn_ref(x, w1, b1, w2, b2):
    return jnp.maximum(x @ w1 + b1, 0.0) @ w2 + b2


def ref_encoder_layer(x, p, n_head, mask):
    x = ref_layer_norm(x + ref_mha(x, x, p['attn'], n_head, mask), p['ln1_g'], p['ln1_b'])
    x = ref_layer_norm(x + ffn_ref(x, p['w1'], p['b1'], p['w2'], p['b2']),
                       p['ln2_g'], p['ln2_b'])
    return x


def ref_decoder_layer(x, mem, p, n_head, tgt_mask):
    x = ref_layer_norm(x + ref_mha(x, x, p['self_attn'], n_head, tgt_mask),
                       p['ln1_g'], p['ln1_b'])
    x = ref_layer_norm(x + ref_mha(x, mem, p['cross_attn'], n_head, None),
                       p['ln2_g'], p['ln2_b'])
    x = ref_layer_norm(x + ffn_ref(x, p['w1'], p['b1'], p['w2'], p['b2']),
                       p['ln3_g'], p['ln3_b'])
    return x


def ref_embed(tokens, table, pos, d_model):
    return jnp.take(table, tokens, axis=0) * math.sqrt(d_model) + pos[:tokens.shape[1]][None]


def ref_transformer(params, src, tgt, src_mask, tgt_mask, *, n_head, d_model):
    mem = ref_embed(src, params['src_emb'], params['pos_emb'], d_model)
    for p in params['encoder_layers']:
        mem = ref_encoder_layer(mem, p, n_head, src_mask)
    x = ref_embed(tgt, params['tgt_emb'], params['pos_emb'], d_model)
    for p in params['decoder_layers']:
        x = ref_decoder_layer(x, mem, p, n_head, tgt_mask)
    return ref_linear(x, params['gen_w'], params['gen_b'])


if __name__ == "__main__":
    key = jax.random.PRNGKey(0)
    k_params, k_src, k_tgt, k_ffx, k_ffp = jax.random.split(key, 5)

    # Small TransformerScratch config.
    d_model, n_head, dim_ff = 32, 4, 64
    n_enc, n_dec = 2, 2
    src_vocab, tgt_vocab = 37, 41
    max_len = 16
    B, S_src, S_tgt = 2, 10, 8

    params = init_transformer(k_params, n_enc=n_enc, n_dec=n_dec, d_model=d_model,
                              dim_ff=dim_ff, src_vocab=src_vocab, tgt_vocab=tgt_vocab,
                              max_len=max_len)
    src = jax.random.randint(k_src, (B, S_src), 0, src_vocab)
    tgt = jax.random.randint(k_tgt, (B, S_tgt), 0, tgt_vocab)
    src_mask = jnp.zeros((S_src, S_src), jnp.float32)
    tgt_mask = jnp.where(jnp.arange(S_tgt)[None, :] <= jnp.arange(S_tgt)[:, None],
                         0.0, -1e9).astype(jnp.float32)

    # 1) Full Pallas-composed transformer forward vs pure-JAX reference.
    fwd = jax.jit(partial(transformer_forward, n_head=n_head, d_model=d_model))
    out = jax.block_until_ready(fwd(params, src, tgt, src_mask, tgt_mask))
    with jax.default_matmul_precision("highest"):
        ref = ref_transformer(params, src, tgt, src_mask, tgt_mask,
                              n_head=n_head, d_model=d_model)
    assert out.shape == (B, S_tgt, tgt_vocab)
    assert bool(jnp.isfinite(out).all()), "non-finite output"
    assert jnp.allclose(out, ref, atol=1e-2, rtol=1e-2), "transformer forward mismatch"

    # 2) Fused FFN multi-tile path: 2 row tiles x 2 dim_ff reduction tiles.
    bb, ss, dm2, ff2 = 2, 256, 256, 1024
    x_big = jax.random.normal(k_ffx, (bb, ss, dm2), jnp.float32)
    kp = jax.random.split(k_ffp, 4)
    pw1, pb1 = init_linear(kp[0], dm2, ff2)
    pw2, pb2 = init_linear(kp[1], ff2, dm2)
    out_big = jax.block_until_ready(
        feed_forward(x_big, pw1, pb1, pw2, pb2, row_tile=256, ff_tile=512))
    with jax.default_matmul_precision("highest"):
        ref_big = ffn_ref(x_big, pw1, pb1, pw2, pb2)
    assert out_big.shape == (bb, ss, dm2)
    assert jnp.allclose(out_big, ref_big, atol=1e-2, rtol=1e-2), "tiled FFN mismatch"

    print("KERNEL_OK")
</pallas_src>

<mosaic_0001>
module attributes {stable_mosaic.version = 11 : i64} {
  func.func @_embed_pos_kernel(%arg0: i32, %arg1: memref<1x8x128xf32, #tpu.memory_space<vmem>>, %arg2: memref<8x128xf32, #tpu.memory_space<vmem>>, %arg3: memref<1x8x128xf32, #tpu.memory_space<vmem>>) attributes {dimension_semantics = [#tpu.dimension_semantics<parallel>], iteration_bounds = array<i64: 2>, scalar_prefetch = 0 : i64, scratch_operands = 0 : i64, tpu.core_type = #tpu.core_type<tc>, window_params = [{transform_indices = @transform_0, window_bounds = array<i64: 1, 8, 128>}, {pipeline_mode = #tpu.pipeline_mode<synchronous>, transform_indices = @transform_1, window_bounds = array<i64: 8, 128>}, {transform_indices = @transform_2, window_bounds = array<i64: 1, 8, 128>}]} {
    %c0 = arith.constant 0 : index
    %c0_0 = arith.constant 0 : index
    %c0_1 = arith.constant 0 : index
    %0 = vector.load %arg1[%c0, %c0_0, %c0_1] : memref<1x8x128xf32, #tpu.memory_space<vmem>>, vector<1x8x128xf32>
    %cst = arith.constant 5.65685415 : f32
    %1 = vector.broadcast %cst : f32 to vector<1x8x128xf32>
    %2 = arith.mulf %0, %1 : vector<1x8x128xf32>
    %c0_2 = arith.constant 0 : index
    %c0_3 = arith.constant 0 : index
    %3 = vector.load %arg2[%c0_2, %c0_3] : memref<8x128xf32, #tpu.memory_space<vmem>>, vector<8x128xf32>
    %4 = vector.shape_cast %3 : vector<8x128xf32> to vector<1x8x128xf32>
    %5 = arith.addf %2, %4 : vector<1x8x128xf32>
    %c0_4 = arith.constant 0 : index
    %c0_5 = arith.constant 0 : index
    %c0_6 = arith.constant 0 : index
    %6 = vector.load %arg3[%c0_4, %c0_5, %c0_6] : memref<1x8x128xf32, #tpu.memory_space<vmem>>, vector<1x8x128xf32>
    tpu.vector_store %arg3[%c0_4, %c0_5, %c0_6], %5 {strides = array<i32>} : memref<1x8x128xf32, #tpu.memory_space<vmem>>, vector<1x8x128xf32>,
    return
  }
  func.func @transform_0(%arg0: i32) -> (i32, i32, i32) {
    %c0_i32 = arith.constant 0 : i32
    %c0_i32_0 = arith.constant 0 : i32
    %c0_i32_1 = arith.constant 0 : i32
    return %arg0, %c0_i32, %c0_i32_0 : i32, i32, i32
  }
  func.func @transform_1(%arg0: i32) -> (i32, i32) {
    %c0_i32 = arith.constant 0 : i32
    %c0_i32_0 = arith.constant 0 : i32
    %c0_i32_1 = arith.constant 0 : i32
    return %c0_i32, %c0_i32_0 : i32, i32
  }
  func.func @transform_2(%arg0: i32) -> (i32, i32, i32) {
    %c0_i32 = arith.constant 0 : i32
    %c0_i32_0 = arith.constant 0 : i32
    %c0_i32_1 = arith.constant 0 : i32
    return %arg0, %c0_i32, %c0_i32_0 : i32, i32, i32
  }
}

module attributes {stable_mosaic.version = 11 : i64} {
  func.func @_linear_kernel(%arg0: i32, %arg1: i32, %arg2: memref<16x128xf32, #tpu.memory_space<vmem>>, %arg3: memref<128x128xf32, #tpu.memory_space<vmem>>, %arg4: memref<1x128xf32, #tpu.memory_space<vmem>>, %arg5: memref<16x128xf32, #tpu.memory_space<vmem>>) attributes {dimension_semantics = [#tpu.dimension_semantics<parallel>, #tpu.dimension_semantics<parallel>], iteration_bounds = array<i64: 1, 1>, scalar_prefetch = 0 : i64, scratch_operands = 0 : i64, tpu.core_type = #tpu.core_type<tc>, window_params = [{transform_indices = @transform_0, window_bounds = array<i64: 16, 128>}, {transform_indices = @transform_1, window_bounds = array<i64: 128, 128>}, {transform_indices = @transform_2, window_bounds = array<i64: 1, 128>}, {transform_indices = @transform_3, window_bounds = array<i64: 16, 128>}]} {
    %c0 = arith.constant 0 : index
    %c0_0 = arith.constant 0 : index
    %0 = vector.load %arg2[%c0, %c0_0] : memref<16x128xf32, #tpu.memory_space<vmem>>, vector<16x128xf32>
    %c0_1 = arith.constant 0 : index
    %c0_2 = arith.constant 0 : index
    %1 = vector.load %arg3[%c0_1, %c0_2] : memref<128x128xf32, #tpu.memory_space<vmem>>, vector<128x128xf32>
    %cst = arith.constant dense<0.000000e+00> : vector<16x128xf32>
    %2 = tpu.matmul %0, %1, %cst {dimension_numbers = #tpu.dot_dimension_numbers<[1], [0], [0], [1], [0, 0, 1, 1], [], []>} : vector<16x128xf32>, vector<128x128xf32>, vector<16x128xf32> -> vector<16x128xf32>
    %c0_3 = arith.constant 0 : index
    %c0_4 = arith.constant 0 : index
    %3 = vector.load %arg4[%c0_3, %c0_4] : memref<1x128xf32, #tpu.memory_space<vmem>>, vector<1x128xf32>
    %4 = vector.broadcast %3 : vector<1x128xf32> to vector<16x128xf32>
    %5 = arith.addf %2, %4 : vector<16x128xf32>
    %c0_5 = arith.constant 0 : index
    %c0_6 = arith.constant 0 : index
    %6 = vector.load %arg5[%c0_5, %c0_6] : memref<16x128xf32, #tpu.memory_space<vmem>>, vector<16x128xf32>
    tpu.vector_store %arg5[%c0_5, %c0_6], %5 {strides = array<i32>} : memref<16x128xf32, #tpu.memory_space<vmem>>, vector<16x128xf32>,
    return
  }
  func.func @transform_0(%arg0: i32, %arg1: i32) -> (i32, i32) {
    %c0_i32 = arith.constant 0 : i32
    %c0_i32_0 = arith.constant 0 : i32
    return %arg0, %c0_i32 : i32, i32
  }
  func.func @transform_1(%arg0: i32, %arg1: i32) -> (i32, i32) {
    %c0_i32 = arith.constant 0 : i32
    %c0_i32_0 = arith.constant 0 : i32
    return %c0_i32, %arg1 : i32, i32
  }
  func.func @transform_2(%arg0: i32, %arg1: i32) -> (i32, i32) {
    %c0_i32 = arith.constant 0 : i32
    %c0_i32_0 = arith.constant 0 : i32
    return %c0_i32, %arg1 : i32, i32
  }
  func.func @transform_3(%arg0: i32, %arg1: i32) -> (i32, i32) {
    %c0_i32 = arith.constant 0 : i32
    return %arg0, %arg1 : i32, i32
  }
}

module attributes {stable_mosaic.version = 11 : i64} {
  func.func @_attn_kernel(%arg0: i32, %arg1: memref<1x8x128xf32, #tpu.memory_space<vmem>>, %arg2: memref<1x128x128xf32, #tpu.memory_space<vmem>>, %arg3: memref<1x128x128xf32, #tpu.memory_space<vmem>>, %arg4: memref<8x128xf32, #tpu.memory_space<vmem>>, %arg5: memref<1x8x128xf32, #tpu.memory_space<vmem>>) attributes {dimension_semantics = [#tpu.dimension_semantics<parallel>], iteration_bounds = array<i64: 8>, scalar_prefetch = 0 : i64, scratch_operands = 0 : i64, tpu.core_type = #tpu.core_type<tc>, window_params = [{transform_indices = @transform_0, window_bounds = array<i64: 1, 8, 128>}, {transform_indices = @transform_1, window_bounds = array<i64: 1, 128, 128>}, {transform_indices = @transform_2, window_bounds = array<i64: 1, 128, 128>}, {pipeline_mode = #tpu.pipeline_mode<synchronous>, transform_indices = @transform_3, window_bounds = array<i64: 8, 128>}, {transform_indices = @transform_4, window_bounds = array<i64: 1, 8, 128>}]} {
    %c0 = arith.constant 0 : index
    %c0_0 = arith.constant 0 : index
    %c0_1 = arith.constant 0 : index
    %0 = vector.load %arg1[%c0, %c0_0, %c0_1] : memref<1x8x128xf32, #tpu.memory_space<vmem>>, vector<1x8x128xf32>
    %1 = vector.shape_cast %0 : vector<1x8x128xf32> to vector<8x128xf32>
    %c0_2 = arith.constant 0 : index
    %c0_3 = arith.constant 0 : index
    %c0_4 = arith.constant 0 : index
    %2 = vector.load %arg2[%c0_2, %c0_3, %c0_4] : memref<1x128x128xf32, #tpu.memory_space<vmem>>, vector<1x128x128xf32>
    %3 = vector.shape_cast %2 : vector<1x128x128xf32> to vector<128x128xf32>
    %c0_5 = arith.constant 0 : index
    %c0_6 = arith.constant 0 : index
    %c0_7 = arith.constant 0 : index
    %4 = vector.load %arg3[%c0_5, %c0_6, %c0_7] : memref<1x128x128xf32, #tpu.memory_space<vmem>>, vector<1x128x128xf32>
    %5 = vector.shape_cast %4 : vector<1x128x128xf32> to vector<128x128xf32>
    %cst = arith.constant dense<0.000000e+00> : vector<8x128xf32>
    %6 = tpu.matmul %1, %3, %cst {dimension_numbers = #tpu.dot_dimension_numbers<[1], [1], [0], [0], [0, 0, 1, 0], [], []>} : vector<8x128xf32>, vector<128x128xf32>, vector<8x128xf32> -> vector<8x128xf32>
    %cst_8 = arith.constant 0.353553385 : f32
    %7 = vector.broadcast %cst_8 : f32 to vector<8x128xf32>
    %8 = arith.mulf %6, %7 : vector<8x128xf32>
    %c0_9 = arith.constant 0 : index
    %c0_10 = arith.constant 0 : index
    %9 = vector.load %arg4[%c0_9, %c0_10] : memref<8x128xf32, #tpu.memory_space<vmem>>, vector<8x128xf32>
    %10 = arith.addf %8, %9 : vector<8x128xf32>
    %cst_11 = arith.constant dense<0xFF800000> : vector<8xf32>
    %11 = vector.multi_reduction <maximumf>, %10, %cst_11 [1] : vector<8x128xf32> to vector<8xf32>
    %12 = vector.shape_cast %11 : vector<8xf32> to vector<8x1xf32>
    %13 = vector.broadcast %12 : vector<8x1xf32> to vector<8x128xf32>
    %14 = arith.subf %10, %13 : vector<8x128xf32>
    %15 = math.exp %14 : vector<8x128xf32>
    %cst_12 = arith.constant dense<0.000000e+00> : vector<8xf32>
    %16 = vector.multi_reduction <add>, %15, %cst_12 [1] : vector<8x128xf32> to vector<8xf32>
    %17 = vector.shape_cast %16 : vector<8xf32> to vector<8x1xf32>
    %cst_13 = arith.constant dense<0.000000e+00> : vector<8x128xf32>
    %18 = tpu.matmul %15, %5, %cst_13 {dimension_numbers = #tpu.dot_dimension_numbers<[1], [0], [0], [1], [0, 0, 1, 1], [], []>} : vector<8x128xf32>, vector<128x128xf32>, vector<8x128xf32> -> vector<8x128xf32>
    %19 = vector.broadcast %17 : vector<8x1xf32> to vector<8x128xf32>
    %20 = arith.divf %18, %19 : vector<8x128xf32>
    %c0_14 = arith.constant 0 : index
    %c0_15 = arith.constant 0 : index
    %c0_16 = arith.constant 0 : index
    %21 = vector.load %arg5[%c0_14, %c0_15, %c0_16] : memref<1x8x128xf32, #tpu.memory_space<vmem>>, vector<1x8x128xf32>
    %22 = vector.shape_cast %21 : vector<1x8x128xf32> to vector<8x128xf32>
    %23 = vector.shape_cast %20 : vector<8x128xf32> to vector<1x8x128xf32>
    tpu.vector_store %arg5[%c0_14, %c0_15, %c0_16], %23 {strides = array<i32>} : memref<1x8x128xf32, #tpu.memory_space<vmem>>, vector<1x8x128xf32>,
    return
  }
  func.func @transform_0(%arg0: i32) -> (i32, i32, i32) {
    %c0_i32 = arith.constant 0 : i32
    %c0_i32_0 = arith.constant 0 : i32
    %c0_i32_1 = arith.constant 0 : i32
    return %arg0, %c0_i32, %c0_i32_0 : i32, i32, i32
  }
  func.func @transform_1(%arg0: i32) -> (i32, i32, i32) {
    %c0_i32 = arith.constant 0 : i32
    %c0_i32_0 = arith.constant 0 : i32
    %c0_i32_1 = arith.constant 0 : i32
    return %arg0, %c0_i32, %c0_i32_0 : i32, i32, i32
  }
  func.func @transform_2(%arg0: i32) -> (i32, i32, i32) {
    %c0_i32 = arith.constant 0 : i32
    %c0_i32_0 = arith.constant 0 : i32
    %c0_i32_1 = arith.constant 0 : i32
    return %arg0, %c0_i32, %c0_i32_0 : i32, i32, i32
  }
  func.func @transform_3(%arg0: i32) -> (i32, i32) {
    %c0_i32 = arith.constant 0 : i32
    %c0_i32_0 = arith.constant 0 : i32
    %c0_i32_1 = arith.constant 0 : i32
    return %c0_i32, %c0_i32_0 : i32, i32
  }
  func.func @transform_4(%arg0: i32) -> (i32, i32, i32) {
    %c0_i32 = arith.constant 0 : i32
    %c0_i32_0 = arith.constant 0 : i32
    %c0_i32_1 = arith.constant 0 : i32
    return %arg0, %c0_i32, %c0_i32_0 : i32, i32, i32
  }
}

module attributes {stable_mosaic.version = 11 : i64} {
  func.func @_add_ln_kernel(%arg0: i32, %arg1: memref<16x128xf32, #tpu.memory_space<vmem>>, %arg2: memref<16x128xf32, #tpu.memory_space<vmem>>, %arg3: memref<1x128xf32, #tpu.memory_space<vmem>>, %arg4: memref<1x128xf32, #tpu.memory_space<vmem>>, %arg5: memref<16x128xf32, #tpu.memory_space<vmem>>) attributes {dimension_semantics = [#tpu.dimension_semantics<parallel>], iteration_bounds = array<i64: 1>, scalar_prefetch = 0 : i64, scratch_operands = 0 : i64, tpu.core_type = #tpu.core_type<tc>, window_params = [{transform_indices = @transform_0, window_bounds = array<i64: 16, 128>}, {transform_indices = @transform_1, window_bounds = array<i64: 16, 128>}, {pipeline_mode = #tpu.pipeline_mode<synchronous>, transform_indices = @transform_2, window_bounds = array<i64: 1, 128>}, {pipeline_mode = #tpu.pipeline_mode<synchronous>, transform_indices = @transform_3, window_bounds = array<i64: 1, 128>}, {transform_indices = @transform_4, window_bounds = array<i64: 16, 128>}]} {
    %c0 = arith.constant 0 : index
    %c0_0 = arith.constant 0 : index
    %0 = vector.load %arg1[%c0, %c0_0] : memref<16x128xf32, #tpu.memory_space<vmem>>, vector<16x128xf32>
    %c0_1 = arith.constant 0 : index
    %c0_2 = arith.constant 0 : index
    %1 = vector.load %arg2[%c0_1, %c0_2] : memref<16x128xf32, #tpu.memory_space<vmem>>, vector<16x128xf32>
    %2 = arith.addf %0, %1 : vector<16x128xf32>
    %3 = tpu.iota {dimensions = array<i32: 1>} : vector<16x128xi32>
    %c32_i32 = arith.constant 32 : i32
    %4 = vector.broadcast %c32_i32 : i32 to vector<16x128xi32>
    %5 = arith.cmpi slt, %3, %4 : vector<16x128xi32>
    %cst = arith.constant dense<0.000000e+00> : vector<16xf32>
    %6 = vector.multi_reduction <add>, %2, %cst [1] : vector<16x128xf32> to vector<16xf32>
    %7 = vector.shape_cast %6 : vector<16xf32> to vector<16x1xf32>
    %cst_3 = arith.constant 3.125000e-02 : f32
    %8 = vector.broadcast %cst_3 : f32 to vector<16x1xf32>
    %9 = arith.mulf %7, %8 : vector<16x1xf32>
    %10 = vector.broadcast %9 : vector<16x1xf32> to vector<16x128xf32>
    %11 = arith.subf %2, %10 : vector<16x128xf32>
    %cst_4 = arith.constant 0.000000e+00 : f32
    %12 = vector.broadcast %cst_4 : f32 to vector<16x128xf32>
    %13 = arith.select %5, %11, %12 : vector<16x128xi1>, vector<16x128xf32>
    %14 = arith.mulf %13, %13 : vector<16x128xf32>
    %cst_5 = arith.constant dense<0.000000e+00> : vector<16xf32>
    %15 = vector.multi_reduction <add>, %14, %cst_5 [1] : vector<16x128xf32> to vector<16xf32>
    %16 = vector.shape_cast %15 : vector<16xf32> to vector<16x1xf32>
    %cst_6 = arith.constant 3.125000e-02 : f32
    %17 = vector.broadcast %cst_6 : f32 to vector<16x1xf32>
    %18 = arith.mulf %16, %17 : vector<16x1xf32>
    %cst_7 = arith.constant 9.99999974E-6 : f32
    %19 = vector.broadcast %cst_7 : f32 to vector<16x1xf32>
    %20 = arith.addf %18, %19 : vector<16x1xf32>
    %21 = math.rsqrt %20 : vector<16x1xf32>
    %22 = vector.broadcast %21 : vector<16x1xf32> to vector<16x128xf32>
    %23 = arith.mulf %13, %22 : vector<16x128xf32>
    %c0_8 = arith.constant 0 : index
    %c0_9 = arith.constant 0 : index
    %24 = vector.load %arg3[%c0_8, %c0_9] : memref<1x128xf32, #tpu.memory_space<vmem>>, vector<1x128xf32>
    %25 = vector.broadcast %24 : vector<1x128xf32> to vector<16x128xf32>
    %26 = arith.mulf %23, %25 : vector<16x128xf32>
    %c0_10 = arith.constant 0 : index
    %c0_11 = arith.constant 0 : index
    %27 = vector.load %arg4[%c0_10, %c0_11] : memref<1x128xf32, #tpu.memory_space<vmem>>, vector<1x128xf32>
    %28 = vector.broadcast %27 : vector<1x128xf32> to vector<16x128xf32>
    %29 = arith.addf %26, %28 : vector<16x128xf32>
    %c0_12 = arith.constant 0 : index
    %c0_13 = arith.constant 0 : index
    %30 = vector.load %arg5[%c0_12, %c0_13] : memref<16x128xf32, #tpu.memory_space<vmem>>, vector<16x128xf32>
    tpu.vector_store %arg5[%c0_12, %c0_13], %29 {strides = array<i32>} : memref<16x128xf32, #tpu.memory_space<vmem>>, vector<16x128xf32>,
    return
  }
  func.func @transform_0(%arg0: i32) -> (i32, i32) {
    %c0_i32 = arith.constant 0 : i32
    %c0_i32_0 = arith.constant 0 : i32
    return %arg0, %c0_i32 : i32, i32
  }
  func.func @transform_1(%arg0: i32) -> (i32, i32) {
    %c0_i32 = arith.constant 0 : i32
    %c0_i32_0 = arith.constant 0 : i32
    return %arg0, %c0_i32 : i32, i32
  }
  func.func @transform_2(%arg0: i32) -> (i32, i32) {
    %c0_i32 = arith.constant 0 : i32
    %c0_i32_0 = arith.constant 0 : i32
    %c0_i32_1 = arith.constant 0 : i32
    return %c0_i32, %c0_i32_0 : i32, i32
  }
  func.func @transform_3(%arg0: i32) -> (i32, i32) {
    %c0_i32 = arith.constant 0 : i32
    %c0_i32_0 = arith.constant 0 : i32
    %c0_i32_1 = arith.constant 0 : i32
    return %c0_i32, %c0_i32_0 : i32, i32
  }
  func.func @transform_4(%arg0: i32) -> (i32, i32) {
    %c0_i32 = arith.constant 0 : i32
    %c0_i32_0 = arith.constant 0 : i32
    return %arg0, %c0_i32 : i32, i32
  }
}

module attributes {stable_mosaic.version = 11 : i64} {
  func.func @_embed_pos_kernel(%arg0: i32, %arg1: memref<1x16x128xf32, #tpu.memory_space<vmem>>, %arg2: memref<16x128xf32, #tpu.memory_space<vmem>>, %arg3: memref<1x16x128xf32, #tpu.memory_space<vmem>>) attributes {dimension_semantics = [#tpu.dimension_semantics<parallel>], iteration_bounds = array<i64: 2>, scalar_prefetch = 0 : i64, scratch_operands = 0 : i64, tpu.core_type = #tpu.core_type<tc>, window_params = [{transform_indices = @transform_0, window_bounds = array<i64: 1, 16, 128>}, {pipeline_mode = #tpu.pipeline_mode<synchronous>, transform_indices = @transform_1, window_bounds = array<i64: 16, 128>}, {transform_indices = @transform_2, window_bounds = array<i64: 1, 16, 128>}]} {
    %c0 = arith.constant 0 : index
    %c0_0 = arith.constant 0 : index
    %c0_1 = arith.constant 0 : index
    %0 = vector.load %arg1[%c0, %c0_0, %c0_1] : memref<1x16x128xf32, #tpu.memory_space<vmem>>, vector<1x16x128xf32>
    %cst = arith.constant 5.65685415 : f32
    %1 = vector.broadcast %cst : f32 to vector<1x16x128xf32>
    %2 = arith.mulf %0, %1 : vector<1x16x128xf32>
    %c0_2 = arith.constant 0 : index
    %c0_3 = arith.constant 0 : index
    %3 = vector.load %arg2[%c0_2, %c0_3] : memref<16x128xf32, #tpu.memory_space<vmem>>, vector<16x128xf32>
    %4 = vector.shape_cast %3 : vector<16x128xf32> to vector<1x16x128xf32>
    %5 = arith.addf %2, %4 : vector<1x16x128xf32>
    %c0_4 = arith.constant 0 : index
    %c0_5 = arith.constant 0 : index
    %c0_6 = arith.constant 0 : index
    %6 = vector.load %arg3[%c0_4, %c0_5, %c0_6] : memref<1x16x128xf32, #tpu.memory_space<vmem>>, vector<1x16x128xf32>
    tpu.vector_store %arg3[%c0_4, %c0_5, %c0_6], %5 {strides = array<i32>} : memref<1x16x128xf32, #tpu.memory_space<vmem>>, vector<1x16x128xf32>,
    return
  }
  func.func @transform_0(%arg0: i32) -> (i32, i32, i32) {
    %c0_i32 = arith.constant 0 : i32
    %c0_i32_0 = arith.constant 0 : i32
    %c0_i32_1 = arith.constant 0 : i32
    return %arg0, %c0_i32, %c0_i32_0 : i32, i32, i32
  }
  func.func @transform_1(%arg0: i32) -> (i32, i32) {
    %c0_i32 = arith.constant 0 : i32
    %c0_i32_0 = arith.constant 0 : i32
    %c0_i32_1 = arith.constant 0 : i32
    return %c0_i32, %c0_i32_0 : i32, i32
  }
  func.func @transform_2(%arg0: i32) -> (i32, i32, i32) {
    %c0_i32 = arith.constant 0 : i32
    %c0_i32_0 = arith.constant 0 : i32
    %c0_i32_1 = arith.constant 0 : i32
    return %arg0, %c0_i32, %c0_i32_0 : i32, i32, i32
  }
}

module attributes {stable_mosaic.version = 11 : i64} {
  func.func @_linear_kernel(%arg0: i32, %arg1: i32, %arg2: memref<24x128xf32, #tpu.memory_space<vmem>>, %arg3: memref<128x128xf32, #tpu.memory_space<vmem>>, %arg4: memref<1x128xf32, #tpu.memory_space<vmem>>, %arg5: memref<24x128xf32, #tpu.memory_space<vmem>>) attributes {dimension_semantics = [#tpu.dimension_semantics<parallel>, #tpu.dimension_semantics<parallel>], iteration_bounds = array<i64: 1, 1>, scalar_prefetch = 0 : i64, scratch_operands = 0 : i64, tpu.core_type = #tpu.core_type<tc>, window_params = [{transform_indices = @transform_0, window_bounds = array<i64: 24, 128>}, {transform_indices = @transform_1, window_bounds = array<i64: 128, 128>}, {transform_indices = @transform_2, window_bounds = array<i64: 1, 128>}, {transform_indices = @transform_3, window_bounds = array<i64: 24, 128>}]} {
    %c0 = arith.constant 0 : index
    %c0_0 = arith.constant 0 : index
    %0 = vector.load %arg2[%c0, %c0_0] : memref<24x128xf32, #tpu.memory_space<vmem>>, vector<24x128xf32>
    %c0_1 = arith.constant 0 : index
    %c0_2 = arith.constant 0 : index
    %1 = vector.load %arg3[%c0_1, %c0_2] : memref<128x128xf32, #tpu.memory_space<vmem>>, vector<128x128xf32>
    %cst = arith.constant dense<0.000000e+00> : vector<24x128xf32>
    %2 = tpu.matmul %0, %1, %cst {dimension_numbers = #tpu.dot_dimension_numbers<[1], [0], [0], [1], [0, 0, 1, 1], [], []>} : vector<24x128xf32>, vector<128x128xf32>, vector<24x128xf32> -> vector<24x128xf32>
    %c0_3 = arith.constant 0 : index
    %c0_4 = arith.constant 0 : index
    %3 = vector.load %arg4[%c0_3, %c0_4] : memref<1x128xf32, #tpu.memory_space<vmem>>, vector<1x128xf32>
    %4 = vector.broadcast %3 : vector<1x128xf32> to vector<24x128xf32>
    %5 = arith.addf %2, %4 : vector<24x128xf32>
    %c0_5 = arith.constant 0 : index
    %c0_6 = arith.constant 0 : index
    %6 = vector.load %arg5[%c0_5, %c0_6] : memref<24x128xf32, #tpu.memory_space<vmem>>, vector<24x128xf32>
    tpu.vector_store %arg5[%c0_5, %c0_6], %5 {strides = array<i32>} : memref<24x128xf32, #tpu.memory_space<vmem>>, vector<24x128xf32>,
    return
  }
  func.func @transform_0(%arg0: i32, %arg1: i32) -> (i32, i32) {
    %c0_i32 = arith.constant 0 : i32
    %c0_i32_0 = arith.constant 0 : i32
    return %arg0, %c0_i32 : i32, i32
  }
  func.func @transform_1(%arg0: i32, %arg1: i32) -> (i32, i32) {
    %c0_i32 = arith.constant 0 : i32
    %c0_i32_0 = arith.constant 0 : i32
    return %c0_i32, %arg1 : i32, i32
  }
  func.func @transform_2(%arg0: i32, %arg1: i32) -> (i32, i32) {
    %c0_i32 = arith.constant 0 : i32
    %c0_i32_0 = arith.constant 0 : i32
    return %c0_i32, %arg1 : i32, i32
  }
  func.func @transform_3(%arg0: i32, %arg1: i32) -> (i32, i32) {
    %c0_i32 = arith.constant 0 : i32
    return %arg0, %arg1 : i32, i32
  }
}

module attributes {stable_mosaic.version = 11 : i64} {
  func.func @_attn_kernel(%arg0: i32, %arg1: memref<1x16x128xf32, #tpu.memory_space<vmem>>, %arg2: memref<1x128x128xf32, #tpu.memory_space<vmem>>, %arg3: memref<1x128x128xf32, #tpu.memory_space<vmem>>, %arg4: memref<16x128xf32, #tpu.memory_space<vmem>>, %arg5: memref<1x16x128xf32, #tpu.memory_space<vmem>>) attributes {dimension_semantics = [#tpu.dimension_semantics<parallel>], iteration_bounds = array<i64: 8>, scalar_prefetch = 0 : i64, scratch_operands = 0 : i64, tpu.core_type = #tpu.core_type<tc>, window_params = [{transform_indices = @transform_0, window_bounds = array<i64: 1, 16, 128>}, {transform_indices = @transform_1, window_bounds = array<i64: 1, 128, 128>}, {transform_indices = @transform_2, window_bounds = array<i64: 1, 128, 128>}, {pipeline_mode = #tpu.pipeline_mode<synchronous>, transform_indices = @transform_3, window_bounds = array<i64: 16, 128>}, {transform_indices = @transform_4, window_bounds = array<i64: 1, 16, 128>}]} {
    %c0 = arith.constant 0 : index
    %c0_0 = arith.constant 0 : index
    %c0_1 = arith.constant 0 : index
    %0 = vector.load %arg1[%c0, %c0_0, %c0_1] : memref<1x16x128xf32, #tpu.memory_space<vmem>>, vector<1x16x128xf32>
    %1 = vector.shape_cast %0 : vector<1x16x128xf32> to vector<16x128xf32>
    %c0_2 = arith.constant 0 : index
    %c0_3 = arith.constant 0 : index
    %c0_4 = arith.constant 0 : index
    %2 = vector.load %arg2[%c0_2, %c0_3, %c0_4] : memref<1x128x128xf32, #tpu.memory_space<vmem>>, vector<1x128x128xf32>
    %3 = vector.shape_cast %2 : vector<1x128x128xf32> to vector<128x128xf32>
    %c0_5 = arith.constant 0 : index
    %c0_6 = arith.constant 0 : index
    %c0_7 = arith.constant 0 : index
    %4 = vector.load %arg3[%c0_5, %c0_6, %c0_7] : memref<1x128x128xf32, #tpu.memory_space<vmem>>, vector<1x128x128xf32>
    %5 = vector.shape_cast %4 : vector<1x128x128xf32> to vector<128x128xf32>
    %cst = arith.constant dense<0.000000e+00> : vector<16x128xf32>
    %6 = tpu.matmul %1, %3, %cst {dimension_numbers = #tpu.dot_dimension_numbers<[1], [1], [0], [0], [0, 0, 1, 0], [], []>} : vector<16x128xf32>, vector<128x128xf32>, vector<16x128xf32> -> vector<16x128xf32>
    %cst_8 = arith.constant 0.353553385 : f32
    %7 = vector.broadcast %cst_8 : f32 to vector<16x128xf32>
    %8 = arith.mulf %6, %7 : vector<16x128xf32>
    %c0_9 = arith.constant 0 : index
    %c0_10 = arith.constant 0 : index
    %9 = vector.load %arg4[%c0_9, %c0_10] : memref<16x128xf32, #tpu.memory_space<vmem>>, vector<16x128xf32>
    %10 = arith.addf %8, %9 : vector<16x128xf32>
    %cst_11 = arith.constant dense<0xFF800000> : vector<16xf32>
    %11 = vector.multi_reduction <maximumf>, %10, %cst_11 [1] : vector<16x128xf32> to vector<16xf32>
    %12 = vector.shape_cast %11 : vector<16xf32> to vector<16x1xf32>
    %13 = vector.broadcast %12 : vector<16x1xf32> to vector<16x128xf32>
    %14 = arith.subf %10, %13 : vector<16x128xf32>
    %15 = math.exp %14 : vector<16x128xf32>
    %cst_12 = arith.constant dense<0.000000e+00> : vector<16xf32>
    %16 = vector.multi_reduction <add>, %15, %cst_12 [1] : vector<16x128xf32> to vector<16xf32>
    %17 = vector.shape_cast %16 : vector<16xf32> to vector<16x1xf32>
    %cst_13 = arith.constant dense<0.000000e+00> : vector<16x128xf32>
    %18 = tpu.matmul %15, %5, %cst_13 {dimension_numbers = #tpu.dot_dimension_numbers<[1], [0], [0], [1], [0, 0, 1, 1], [], []>} : vector<16x128xf32>, vector<128x128xf32>, vector<16x128xf32> -> vector<16x128xf32>
    %19 = vector.broadcast %17 : vector<16x1xf32> to vector<16x128xf32>
    %20 = arith.divf %18, %19 : vector<16x128xf32>
    %c0_14 = arith.constant 0 : index
    %c0_15 = arith.constant 0 : index
    %c0_16 = arith.constant 0 : index
    %21 = vector.load %arg5[%c0_14, %c0_15, %c0_16] : memref<1x16x128xf32, #tpu.memory_space<vmem>>, vector<1x16x128xf32>
    %22 = vector.shape_cast %21 : vector<1x16x128xf32> to vector<16x128xf32>
    %23 = vector.shape_cast %20 : vector<16x128xf32> to vector<1x16x128xf32>
    tpu.vector_store %arg5[%c0_14, %c0_15, %c0_16], %23 {strides = array<i32>} : memref<1x16x128xf32, #tpu.memory_space<vmem>>, vector<1x16x128xf32>,
    return
  }
  func.func @transform_0(%arg0: i32) -> (i32, i32, i32) {
    %c0_i32 = arith.constant 0 : i32
    %c0_i32_0 = arith.constant 0 : i32
    %c0_i32_1 = arith.constant 0 : i32
    return %arg0, %c0_i32, %c0_i32_0 : i32, i32, i32
  }
  func.func @transform_1(%arg0: i32) -> (i32, i32, i32) {
    %c0_i32 = arith.constant 0 : i32
    %c0_i32_0 = arith.constant 0 : i32
    %c0_i32_1 = arith.constant 0 : i32
    return %arg0, %c0_i32, %c0_i32_0 : i32, i32, i32
  }
  func.func @transform_2(%arg0: i32) -> (i32, i32, i32) {
    %c0_i32 = arith.constant 0 : i32
    %c0_i32_0 = arith.constant 0 : i32
    %c0_i32_1 = arith.constant 0 : i32
    return %arg0, %c0_i32, %c0_i32_0 : i32, i32, i32
  }
  func.func @transform_3(%arg0: i32) -> (i32, i32) {
    %c0_i32 = arith.constant 0 : i32
    %c0_i32_0 = arith.constant 0 : i32
    %c0_i32_1 = arith.constant 0 : i32
    return %c0_i32, %c0_i32_0 : i32, i32
  }
  func.func @transform_4(%arg0: i32) -> (i32, i32, i32) {
    %c0_i32 = arith.constant 0 : i32
    %c0_i32_0 = arith.constant 0 : i32
    %c0_i32_1 = arith.constant 0 : i32
    return %arg0, %c0_i32, %c0_i32_0 : i32, i32, i32
  }
}

module attributes {stable_mosaic.version = 11 : i64} {
  func.func @_add_ln_kernel(%arg0: i32, %arg1: memref<24x128xf32, #tpu.memory_space<vmem>>, %arg2: memref<24x128xf32, #tpu.memory_space<vmem>>, %arg3: memref<1x128xf32, #tpu.memory_space<vmem>>, %arg4: memref<1x128xf32, #tpu.memory_space<vmem>>, %arg5: memref<24x128xf32, #tpu.memory_space<vmem>>) attributes {dimension_semantics = [#tpu.dimension_semantics<parallel>], iteration_bounds = array<i64: 1>, scalar_prefetch = 0 : i64, scratch_operands = 0 : i64, tpu.core_type = #tpu.core_type<tc>, window_params = [{transform_indices = @transform_0, window_bounds = array<i64: 24, 128>}, {transform_indices = @transform_1, window_bounds = array<i64: 24, 128>}, {pipeline_mode = #tpu.pipeline_mode<synchronous>, transform_indices = @transform_2, window_bounds = array<i64: 1, 128>}, {pipeline_mode = #tpu.pipeline_mode<synchronous>, transform_indices = @transform_3, window_bounds = array<i64: 1, 128>}, {transform_indices = @transform_4, window_bounds = array<i64: 24, 128>}]} {
    %c0 = arith.constant 0 : index
    %c0_0 = arith.constant 0 : index
    %0 = vector.load %arg1[%c0, %c0_0] : memref<24x128xf32, #tpu.memory_space<vmem>>, vector<24x128xf32>
    %c0_1 = arith.constant 0 : index
    %c0_2 = arith.constant 0 : index
    %1 = vector.load %arg2[%c0_1, %c0_2] : memref<24x128xf32, #tpu.memory_space<vmem>>, vector<24x128xf32>
    %2 = arith.addf %0, %1 : vector<24x128xf32>
    %3 = tpu.iota {dimensions = array<i32: 1>} : vector<24x128xi32>
    %c32_i32 = arith.constant 32 : i32
    %4 = vector.broadcast %c32_i32 : i32 to vector<24x128xi32>
    %5 = arith.cmpi slt, %3, %4 : vector<24x128xi32>
    %cst = arith.constant dense<0.000000e+00> : vector<24xf32>
    %6 = vector.multi_reduction <add>, %2, %cst [1] : vector<24x128xf32> to vector<24xf32>
    %7 = vector.shape_cast %6 : vector<24xf32> to vector<24x1xf32>
    %cst_3 = arith.constant 3.125000e-02 : f32
    %8 = vector.broadcast %cst_3 : f32 to vector<24x1xf32>
    %9 = arith.mulf %7, %8 : vector<24x1xf32>
    %10 = vector.broadcast %9 : vector<24x1xf32> to vector<24x128xf32>
    %11 = arith.subf %2, %10 : vector<24x128xf32>
    %cst_4 = arith.constant 0.000000e+00 : f32
    %12 = vector.broadcast %cst_4 : f32 to vector<24x128xf32>
    %13 = arith.select %5, %11, %12 : vector<24x128xi1>, vector<24x128xf32>
    %14 = arith.mulf %13, %13 : vector<24x128xf32>
    %cst_5 = arith.constant dense<0.000000e+00> : vector<24xf32>
    %15 = vector.multi_reduction <add>, %14, %cst_5 [1] : vector<24x128xf32> to vector<24xf32>
    %16 = vector.shape_cast %15 : vector<24xf32> to vector<24x1xf32>
    %cst_6 = arith.constant 3.125000e-02 : f32
    %17 = vector.broadcast %cst_6 : f32 to vector<24x1xf32>
    %18 = arith.mulf %16, %17 : vector<24x1xf32>
    %cst_7 = arith.constant 9.99999974E-6 : f32
    %19 = vector.broadcast %cst_7 : f32 to vector<24x1xf32>
    %20 = arith.addf %18, %19 : vector<24x1xf32>
    %21 = math.rsqrt %20 : vector<24x1xf32>
    %22 = vector.broadcast %21 : vector<24x1xf32> to vector<24x128xf32>
    %23 = arith.mulf %13, %22 : vector<24x128xf32>
    %c0_8 = arith.constant 0 : index
    %c0_9 = arith.constant 0 : index
    %24 = vector.load %arg3[%c0_8, %c0_9] : memref<1x128xf32, #tpu.memory_space<vmem>>, vector<1x128xf32>
    %25 = vector.broadcast %24 : vector<1x128xf32> to vector<24x128xf32>
    %26 = arith.mulf %23, %25 : vector<24x128xf32>
    %c0_10 = arith.constant 0 : index
    %c0_11 = arith.constant 0 : index
    %27 = vector.load %arg4[%c0_10, %c0_11] : memref<1x128xf32, #tpu.memory_space<vmem>>, vector<1x128xf32>
    %28 = vector.broadcast %27 : vector<1x128xf32> to vector<24x128xf32>
    %29 = arith.addf %26, %28 : vector<24x128xf32>
    %c0_12 = arith.constant 0 : index
    %c0_13 = arith.constant 0 : index
    %30 = vector.load %arg5[%c0_12, %c0_13] : memref<24x128xf32, #tpu.memory_space<vmem>>, vector<24x128xf32>
    tpu.vector_store %arg5[%c0_12, %c0_13], %29 {strides = array<i32>} : memref<24x128xf32, #tpu.memory_space<vmem>>, vector<24x128xf32>,
    return
  }
  func.func @transform_0(%arg0: i32) -> (i32, i32) {
    %c0_i32 = arith.constant 0 : i32
    %c0_i32_0 = arith.constant 0 : i32
    return %arg0, %c0_i32 : i32, i32
  }
  func.func @transform_1(%arg0: i32) -> (i32, i32) {
    %c0_i32 = arith.constant 0 : i32
    %c0_i32_0 = arith.constant 0 : i32
    return %arg0, %c0_i32 : i32, i32
  }
  func.func @transform_2(%arg0: i32) -> (i32, i32) {
    %c0_i32 = arith.constant 0 : i32
    %c0_i32_0 = arith.constant 0 : i32
    %c0_i32_1 = arith.constant 0 : i32
    return %c0_i32, %c0_i32_0 : i32, i32
  }
  func.func @transform_3(%arg0: i32) -> (i32, i32) {
    %c0_i32 = arith.constant 0 : i32
    %c0_i32_0 = arith.constant 0 : i32
    %c0_i32_1 = arith.constant 0 : i32
    return %c0_i32, %c0_i32_0 : i32, i32
  }
  func.func @transform_4(%arg0: i32) -> (i32, i32) {
    %c0_i32 = arith.constant 0 : i32
    %c0_i32_0 = arith.constant 0 : i32
    return %arg0, %c0_i32 : i32, i32
  }
}

module attributes {stable_mosaic.version = 11 : i64} {
  func.func @_ffn_kernel(%arg0: i32, %arg1: i32, %arg2: memref<24x128xf32, #tpu.memory_space<vmem>>, %arg3: memref<128x128xf32, #tpu.memory_space<vmem>>, %arg4: memref<1x128xf32, #tpu.memory_space<vmem>>, %arg5: memref<128x128xf32, #tpu.memory_space<vmem>>, %arg6: memref<1x128xf32, #tpu.memory_space<vmem>>, %arg7: memref<24x128xf32, #tpu.memory_space<vmem>>, %arg8: memref<24x128xf32, #tpu.memory_space<vmem>>) attributes {dimension_semantics = [#tpu.dimension_semantics<parallel>, #tpu.dimension_semantics<arbitrary>], iteration_bounds = array<i64: 1, 1>, scalar_prefetch = 0 : i64, scratch_operands = 1 : i64, tpu.core_type = #tpu.core_type<tc>, window_params = [{transform_indices = @transform_0, window_bounds = array<i64: 24, 128>}, {transform_indices = @transform_1, window_bounds = array<i64: 128, 128>}, {transform_indices = @transform_2, window_bounds = array<i64: 1, 128>}, {transform_indices = @transform_3, window_bounds = array<i64: 128, 128>}, {pipeline_mode = #tpu.pipeline_mode<synchronous>, transform_indices = @transform_4, window_bounds = array<i64: 1, 128>}, {transform_indices = @transform_5, window_bounds = array<i64: 24, 128>}]} {
    %c0_i32 = arith.constant 0 : i32
    %0 = arith.cmpi eq, %arg1, %c0_i32 : i32
    %1 = arith.extui %0 : i1 to i32
    %c0_i32_0 = arith.constant 0 : i32
    %2 = arith.cmpi ne, %1, %c0_i32_0 : i32
    scf.if %2 {
      %cst_16 = arith.constant 0.000000e+00 : f32
      %19 = vector.broadcast %cst_16 : f32 to vector<24x128xf32>
      %c0_17 = arith.constant 0 : index
      %c0_18 = arith.constant 0 : index
      %20 = vector.load %arg8[%c0_17, %c0_18] : memref<24x128xf32, #tpu.memory_space<vmem>>, vector<24x128xf32>
      tpu.vector_store %arg8[%c0_17, %c0_18], %19 {strides = array<i32>} : memref<24x128xf32, #tpu.memory_space<vmem>>, vector<24x128xf32>,
    } else {
    }
    %c0 = arith.constant 0 : index
    %c0_1 = arith.constant 0 : index
    %3 = vector.load %arg2[%c0, %c0_1] : memref<24x128xf32, #tpu.memory_space<vmem>>, vector<24x128xf32>
    %c0_2 = arith.constant 0 : index
    %c0_3 = arith.constant 0 : index
    %4 = vector.load %arg3[%c0_2, %c0_3] : memref<128x128xf32, #tpu.memory_space<vmem>>, vector<128x128xf32>
    %cst = arith.constant dense<0.000000e+00> : vector<24x128xf32>
    %5 = tpu.matmul %3, %4, %cst {dimension_numbers = #tpu.dot_dimension_numbers<[1], [0], [0], [1], [0, 0, 1, 1], [], []>} : vector<24x128xf32>, vector<128x128xf32>, vector<24x128xf32> -> vector<24x128xf32>
    %c0_4 = arith.constant 0 : index
    %c0_5 = arith.constant 0 : index
    %6 = vector.load %arg4[%c0_4, %c0_5] : memref<1x128xf32, #tpu.memory_space<vmem>>, vector<1x128xf32>
    %7 = vector.broadcast %6 : vector<1x128xf32> to vector<24x128xf32>
    %8 = arith.addf %5, %7 : vector<24x128xf32>
    %cst_6 = arith.constant 0.000000e+00 : f32
    %9 = vector.broadcast %cst_6 : f32 to vector<24x128xf32>
    %10 = arith.maximumf %8, %9 : vector<24x128xf32>
    %c0_7 = arith.constant 0 : index
    %c0_8 = arith.constant 0 : index
    %11 = vector.load %arg8[%c0_7, %c0_8] : memref<24x128xf32, #tpu.memory_space<vmem>>, vector<24x128xf32>
    %c0_9 = arith.constant 0 : index
    %c0_10 = arith.constant 0 : index
    %12 = vector.load %arg5[%c0_9, %c0_10] : memref<128x128xf32, #tpu.memory_space<vmem>>, vector<128x128xf32>
    %cst_11 = arith.constant dense<0.000000e+00> : vector<24x128xf32>
    %13 = tpu.matmul %10, %12, %cst_11 {dimension_numbers = #tpu.dot_dimension_numbers<[1], [0], [0], [1], [0, 0, 1, 1], [], []>} : vector<24x128xf32>, vector<128x128xf32>, vector<24x128xf32> -> vector<24x128xf32>
    %14 = arith.addf %11, %13 : vector<24x128xf32>
    %c0_12 = arith.constant 0 : index
    %c0_13 = arith.constant 0 : index
    %15 = vector.load %arg8[%c0_12, %c0_13] : memref<24x128xf32, #tpu.memory_space<vmem>>, vector<24x128xf32>
    tpu.vector_store %arg8[%c0_12, %c0_13], %14 {strides = array<i32>} : memref<24x128xf32, #tpu.memory_space<vmem>>, vector<24x128xf32>,
    %c0_i32_14 = arith.constant 0 : i32
    %16 = arith.cmpi eq, %arg1, %c0_i32_14 : i32
    %17 = arith.extui %16 : i1 to i32
    %c0_i32_15 = arith.constant 0 : i32
    %18 = arith.cmpi ne, %17, %c0_i32_15 : i32
    scf.if %18 {
      %c0_16 = arith.constant 0 : index
      %c0_17 = arith.constant 0 : index
      %19 = vector.load %arg8[%c0_16, %c0_17] : memref<24x128xf32, #tpu.memory_space<vmem>>, vector<24x128xf32>
      %c0_18 = arith.constant 0 : index
      %c0_19 = arith.constant 0 : index
      %20 = vector.load %arg6[%c0_18, %c0_19] : memref<1x128xf32, #tpu.memory_space<vmem>>, vector<1x128xf32>
      %21 = vector.broadcast %20 : vector<1x128xf32> to vector<24x128xf32>
      %22 = arith.addf %19, %21 : vector<24x128xf32>
      %c0_20 = arith.constant 0 : index
      %c0_21 = arith.constant 0 : index
      %23 = vector.load %arg7[%c0_20, %c0_21] : memref<24x128xf32, #tpu.memory_space<vmem>>, vector<24x128xf32>
      tpu.vector_store %arg7[%c0_20, %c0_21], %22 {strides = array<i32>} : memref<24x128xf32, #tpu.memory_space<vmem>>, vector<24x128xf32>,
    } else {
    }
    return
  }
  func.func @transform_0(%arg0: i32, %arg1: i32) -> (i32, i32) {
    %c0_i32 = arith.constant 0 : i32
    %c0_i32_0 = arith.constant 0 : i32
    return %arg0, %c0_i32 : i32, i32
  }
  func.func @transform_1(%arg0: i32, %arg1: i32) -> (i32, i32) {
    %c0_i32 = arith.constant 0 : i32
    %c0_i32_0 = arith.constant 0 : i32
    return %c0_i32, %arg1 : i32, i32
  }
  func.func @transform_2(%arg0: i32, %arg1: i32) -> (i32, i32) {
    %c0_i32 = arith.constant 0 : i32
    %c0_i32_0 = arith.constant 0 : i32
    return %c0_i32, %arg1 : i32, i32
  }
  func.func @transform_3(%arg0: i32, %arg1: i32) -> (i32, i32) {
    %c0_i32 = arith.constant 0 : i32
    %c0_i32_0 = arith.constant 0 : i32
    return %arg1, %c0_i32 : i32, i32
  }
  func.func @transform_4(%arg0: i32, %arg1: i32) -> (i32, i32) {
    %c0_i32 = arith.constant 0 : i32
    %c0_i32_0 = arith.constant 0 : i32
    %c0_i32_1 = arith.constant 0 : i32
    return %c0_i32, %c0_i32_0 : i32, i32
  }
  func.func @transform_5(%arg0: i32, %arg1: i32) -> (i32, i32) {
    %c0_i32 = arith.constant 0 : i32
    %c0_i32_0 = arith.constant 0 : i32
    return %arg0, %c0_i32 : i32, i32
  }
}

module attributes {stable_mosaic.version = 11 : i64} {
  func.func @_ffn_kernel(%arg0: i32, %arg1: i32, %arg2: memref<16x128xf32, #tpu.memory_space<vmem>>, %arg3: memref<128x128xf32, #tpu.memory_space<vmem>>, %arg4: memref<1x128xf32, #tpu.memory_space<vmem>>, %arg5: memref<128x128xf32, #tpu.memory_space<vmem>>, %arg6: memref<1x128xf32, #tpu.memory_space<vmem>>, %arg7: memref<16x128xf32, #tpu.memory_space<vmem>>, %arg8: memref<16x128xf32, #tpu.memory_space<vmem>>) attributes {dimension_semantics = [#tpu.dimension_semantics<parallel>, #tpu.dimension_semantics<arbitrary>], iteration_bounds = array<i64: 1, 1>, scalar_prefetch = 0 : i64, scratch_operands = 1 : i64, tpu.core_type = #tpu.core_type<tc>, window_params = [{transform_indices = @transform_0, window_bounds = array<i64: 16, 128>}, {transform_indices = @transform_1, window_bounds = array<i64: 128, 128>}, {transform_indices = @transform_2, window_bounds = array<i64: 1, 128>}, {transform_indices = @transform_3, window_bounds = array<i64: 128, 128>}, {pipeline_mode = #tpu.pipeline_mode<synchronous>, transform_indices = @transform_4, window_bounds = array<i64: 1, 128>}, {transform_indices = @transform_5, window_bounds = array<i64: 16, 128>}]} {
    %c0_i32 = arith.constant 0 : i32
    %0 = arith.cmpi eq, %arg1, %c0_i32 : i32
    %1 = arith.extui %0 : i1 to i32
    %c0_i32_0 = arith.constant 0 : i32
    %2 = arith.cmpi ne, %1, %c0_i32_0 : i32
    scf.if %2 {
      %cst_16 = arith.constant 0.000000e+00 : f32
      %19 = vector.broadcast %cst_16 : f32 to vector<16x128xf32>
      %c0_17 = arith.constant 0 : index
      %c0_18 = arith.constant 0 : index
      %20 = vector.load %arg8[%c0_17, %c0_18] : memref<16x128xf32, #tpu.memory_space<vmem>>, vector<16x128xf32>
      tpu.vector_store %arg8[%c0_17, %c0_18], %19 {strides = array<i32>} : memref<16x128xf32, #tpu.memory_space<vmem>>, vector<16x128xf32>,
    } else {
    }
    %c0 = arith.constant 0 : index
    %c0_1 = arith.constant 0 : index
    %3 = vector.load %arg2[%c0, %c0_1] : memref<16x128xf32, #tpu.memory_space<vmem>>, vector<16x128xf32>
    %c0_2 = arith.constant 0 : index
    %c0_3 = arith.constant 0 : index
    %4 = vector.load %arg3[%c0_2, %c0_3] : memref<128x128xf32, #tpu.memory_space<vmem>>, vector<128x128xf32>
    %cst = arith.constant dense<0.000000e+00> : vector<16x128xf32>
    %5 = tpu.matmul %3, %4, %cst {dimension_numbers = #tpu.dot_dimension_numbers<[1], [0], [0], [1], [0, 0, 1, 1], [], []>} : vector<16x128xf32>, vector<128x128xf32>, vector<16x128xf32> -> vector<16x128xf32>
    %c0_4 = arith.constant 0 : index
    %c0_5 = arith.constant 0 : index
    %6 = vector.load %arg4[%c0_4, %c0_5] : memref<1x128xf32, #tpu.memory_space<vmem>>, vector<1x128xf32>
    %7 = vector.broadcast %6 : vector<1x128xf32> to vector<16x128xf32>
    %8 = arith.addf %5, %7 : vector<16x128xf32>
    %cst_6 = arith.constant 0.000000e+00 : f32
    %9 = vector.broadcast %cst_6 : f32 to vector<16x128xf32>
    %10 = arith.maximumf %8, %9 : vector<16x128xf32>
    %c0_7 = arith.constant 0 : index
    %c0_8 = arith.constant 0 : index
    %11 = vector.load %arg8[%c0_7, %c0_8] : memref<16x128xf32, #tpu.memory_space<vmem>>, vector<16x128xf32>
    %c0_9 = arith.constant 0 : index
    %c0_10 = arith.constant 0 : index
    %12 = vector.load %arg5[%c0_9, %c0_10] : memref<128x128xf32, #tpu.memory_space<vmem>>, vector<128x128xf32>
    %cst_11 = arith.constant dense<0.000000e+00> : vector<16x128xf32>
    %13 = tpu.matmul %10, %12, %cst_11 {dimension_numbers = #tpu.dot_dimension_numbers<[1], [0], [0], [1], [0, 0, 1, 1], [], []>} : vector<16x128xf32>, vector<128x128xf32>, vector<16x128xf32> -> vector<16x128xf32>
    %14 = arith.addf %11, %13 : vector<16x128xf32>
    %c0_12 = arith.constant 0 : index
    %c0_13 = arith.constant 0 : index
    %15 = vector.load %arg8[%c0_12, %c0_13] : memref<16x128xf32, #tpu.memory_space<vmem>>, vector<16x128xf32>
    tpu.vector_store %arg8[%c0_12, %c0_13], %14 {strides = array<i32>} : memref<16x128xf32, #tpu.memory_space<vmem>>, vector<16x128xf32>,
    %c0_i32_14 = arith.constant 0 : i32
    %16 = arith.cmpi eq, %arg1, %c0_i32_14 : i32
    %17 = arith.extui %16 : i1 to i32
    %c0_i32_15 = arith.constant 0 : i32
    %18 = arith.cmpi ne, %17, %c0_i32_15 : i32
    scf.if %18 {
      %c0_16 = arith.constant 0 : index
      %c0_17 = arith.constant 0 : index
      %19 = vector.load %arg8[%c0_16, %c0_17] : memref<16x128xf32, #tpu.memory_space<vmem>>, vector<16x128xf32>
      %c0_18 = arith.constant 0 : index
      %c0_19 = arith.constant 0 : index
      %20 = vector.load %arg6[%c0_18, %c0_19] : memref<1x128xf32, #tpu.memory_space<vmem>>, vector<1x128xf32>
      %21 = vector.broadcast %20 : vector<1x128xf32> to vector<16x128xf32>
      %22 = arith.addf %19, %21 : vector<16x128xf32>
      %c0_20 = arith.constant 0 : index
      %c0_21 = arith.constant 0 : index
      %23 = vector.load %arg7[%c0_20, %c0_21] : memref<16x128xf32, #tpu.memory_space<vmem>>, vector<16x128xf32>
      tpu.vector_store %arg7[%c0_20, %c0_21], %22 {strides = array<i32>} : memref<16x128xf32, #tpu.memory_space<vmem>>, vector<16x128xf32>,
    } else {
    }
    return
  }
  func.func @transform_0(%arg0: i32, %arg1: i32) -> (i32, i32) {
    %c0_i32 = arith.constant 0 : i32
    %c0_i32_0 = arith.constant 0 : i32
    return %arg0, %c0_i32 : i32, i32
  }
  func.func @transform_1(%arg0: i32, %arg1: i32) -> (i32, i32) {
    %c0_i32 = arith.constant 0 : i32
    %c0_i32_0 = arith.constant 0 : i32
    return %c0_i32, %arg1 : i32, i32
  }
  func.func @transform_2(%arg0: i32, %arg1: i32) -> (i32, i32) {
    %c0_i32 = arith.constant 0 : i32
    %c0_i32_0 = arith.constant 0 : i32
    return %c0_i32, %arg1 : i32, i32
  }
  func.func @transform_3(%arg0: i32, %arg1: i32) -> (i32, i32) {
    %c0_i32 = arith.constant 0 : i32
    %c0_i32_0 = arith.constant 0 : i32
    return %arg1, %c0_i32 : i32, i32
  }
  func.func @transform_4(%arg0: i32, %arg1: i32) -> (i32, i32) {
    %c0_i32 = arith.constant 0 : i32
    %c0_i32_0 = arith.constant 0 : i32
    %c0_i32_1 = arith.constant 0 : i32
    return %c0_i32, %c0_i32_0 : i32, i32
  }
  func.func @transform_5(%arg0: i32, %arg1: i32) -> (i32, i32) {
    %c0_i32 = arith.constant 0 : i32
    %c0_i32_0 = arith.constant 0 : i32
    return %arg0, %c0_i32 : i32, i32
  }
}

</mosaic_0001>

<bundles_post_ra>
// kernel: transformer_forward.51
= control target key start
LH: loop header
LB: loop body
LE: loop exit
PB: predicated region body
PF: predicated region fallthrough
CT: control target
= control target key end

     0   :  { %s165_s1 = inlined_call_operand.vmem [shape: f32[128,128], index: 1, kind: input, shape index: {}]   ;;  %s166_s2 = inlined_call_operand.vmem [shape: f32[1,128], index: 2, kind: input, shape index: {}]   ;;  %s167_s0 = inlined_call_operand.vmem [shape: f32[16,128], index: 0, kind: input, shape index: {}]   ;;  %s168_s3 = inlined_call_operand.vmem [shape: f32[16,128], index: 3, kind: output, shape index: {}]  }
   0x1   :  { %v31_v0 = vld [vmem:[%s165_s1 + $0x78] sm:$0xff]  ;;  %v30_v1 = vld [vmem:[%s165_s1 + $0x70] sm:$0xff]  ;;  %v29_v2 = vld [vmem:[%s165_s1 + $0x68] sm:$0xff] }
   0x2   :  { %36 = vmatpush.msra.mxu0 %v31_v0  ;;  %65 = vmatpush.msra.mxu1 %v31_v0  ;;  %v28_v3 = vld [vmem:[%s165_s1 + $0x60] sm:$0xff]  ;;  %v27_v4 = vld [vmem:[%s165_s1 + $0x58] sm:$0xff]  ;;  %v26_v5 = vld [vmem:[%s165_s1 + $0x50] sm:$0xff] }
   0x3   :  { %v25_v6 = vld [vmem:[%s165_s1 + $0x48] sm:$0xff]  ;;  %v24_v7 = vld [vmem:[%s165_s1 + $0x40] sm:$0xff]  ;;  %v23_v8 = vld [vmem:[%s165_s1 + $0x38] sm:$0xff] }
   0x4   :  { %37 = vmatpush.msra.mxu0 %v30_v1  ;;  %66 = vmatpush.msra.mxu1 %v30_v1  ;;  %v22_v9 = vld [vmem:[%s165_s1 + $0x30] sm:$0xff]  ;;  %v21_v10 = vld [vmem:[%s165_s1 + $0x28] sm:$0xff]  ;;  %v20_v11 = vld [vmem:[%s165_s1 + $0x20] sm:$0xff] }
   0x5   :  { %v19_v12 = vld [vmem:[%s165_s1 + $0x18] sm:$0xff]  ;;  %v18_v13 = vld [vmem:[%s165_s1 + $0x10] sm:$0xff]  ;;  %v17_v14 = vld [vmem:[%s165_s1 + $0x8] sm:$0xff] }
   0x6   :  { %38 = vmatpush.msra.mxu0 %v29_v2  ;;  %67 = vmatpush.msra.mxu1 %v29_v2  ;;  %v16_v15 = vld [vmem:[%s165_s1] sm:$0xff]  ;;  %v15_v17 = vld [vmem:[%s167_s0 + $0x8] sm:$0xff] }
   0x7   :  { %v14_v16 = vld [vmem:[%s167_s0] sm:$0xff] }
   0x8   :  { %39 = vmatpush.msra.mxu0 %v28_v3  ;;  %68 = vmatpush.msra.mxu1 %v28_v3  ;;  %v81_v18 = vld [vmem:[%s166_s2] ss:$0 sm:$0xff] }
   0xa   :  { %40 = vmatpush.msra.mxu0 %v27_v4  ;;  %69 = vmatpush.msra.mxu1 %v27_v4 }
   0xc   :  { %41 = vmatpush.msra.mxu0 %v26_v5  ;;  %70 = vmatpush.msra.mxu1 %v26_v5 }
   0xe   :  { %42 = vmatpush.msra.mxu0 %v25_v6  ;;  %71 = vmatpush.msra.mxu1 %v25_v6 }
  0x10   :  { %43 = vmatpush.msra.mxu0 %v24_v7  ;;  %72 = vmatpush.msra.mxu1 %v24_v7 }
  0x12   :  { %44 = vmatpush.msra.mxu0 %v23_v8  ;;  %73 = vmatpush.msra.mxu1 %v23_v8 }
  0x14   :  { %45 = vmatpush.msra.mxu0 %v22_v9  ;;  %74 = vmatpush.msra.mxu1 %v22_v9 }
  0x16   :  { %46 = vmatpush.msra.mxu0 %v21_v10  ;;  %75 = vmatpush.msra.mxu1 %v21_v10 }
  0x18   :  { %47 = vmatpush.msra.mxu0 %v20_v11  ;;  %76 = vmatpush.msra.mxu1 %v20_v11 }
  0x1a   :  { %48 = vmatpush.msra.mxu0 %v19_v12  ;;  %77 = vmatpush.msra.mxu1 %v19_v12 }
  0x1c   :  { %49 = vmatpush.msra.mxu0 %v18_v13  ;;  %78 = vmatpush.msra.mxu1 %v18_v13 }
  0x1e   :  { %50 = vmatpush.msra.mxu0 %v17_v14  ;;  %79 = vmatpush.msra.mxu1 %v17_v14 }
  0x20   :  { %51 = vmatpush.msra.mxu0 %v16_v15  ;;  %80 = vmatpush.msra.mxu1 %v16_v15 }
  0x21   :  { %52 = vmatmul.f32.vlgmr.msra.gmra.mxu0 %v14_v16  ;;  %55 = vmatmul.f32.vlgmr.msra.gmra.mxu1 %v15_v17 }
  0x9e   :  { %v53_v19 = vpop.f32.mrf.mxu0  ;;  %v56_v20 = vpop.f32.mrf.mxu1 }
  0x9f   :  { %v54_v21 = vadd.f32 %v81_v18, %v53_v19  ;;  %v57_v22 = vadd.f32 %v81_v18, %v56_v20 }
  0xa1   :  { %59 = vst [vmem:[%s168_s3] sm:$0xff] %v54_v21 }
  0xa2   :  { %60 = vst [vmem:[%s168_s3 + $0x8] sm:$0xff] %v57_v22 }

// kernel: transformer_forward.50
= control target key start
LH: loop header
LB: loop body
LE: loop exit
PB: predicated region body
PF: predicated region fallthrough
CT: control target
= control target key end

     0   :  { %s218_s9 = smov 0   ;;  %s246_s0 = inlined_call_operand.vmem [shape: f32[2,8,128], index: 0, kind: input, shape index: {}]   ;;  %s247_s1 = inlined_call_operand.vmem [shape: f32[8,128], index: 1, kind: input, shape index: {}]   ;;  %s248_s2 = inlined_call_operand.vmem [shape: f32[2,8,128], index: 2, kind: output, shape index: {}]  }
   0x1 LB: > { %s197_s10 = sadd.s32 4294967295, %s220_s9   ;;  %p201_p0 = scmp.ge.s32.totalorder %s220_s9, 1  ;;  %s220_s9 = sphi %s218_s9, %s12_s9  }
   0x2   : > { %p111_p1 = scmp.lt.s32.totalorder %s220_s9, 3 }
   0x4   : > { %p112_p2 = pnand %p201_p0, %p111_p1 }
   0x5   : > { %p131_p3 = scmp.lt.s32.totalorder (!%p112_p2), %s197_s10, 1 }
   0x6   : > { %115 = sbr.rel (%p112_p2) target bundleno = 20 (0x14), region = 28 }
   0xb   : > { %s250_s10 = smov (!%p131_p3, %s197_s10), 1  ;;  %v141_v1 = vld [vmem:[%s247_s1] sm:$0xff] }
   0xc   : > { %s202_s11 = sshll.u32 %s250_s10, 3 }
   0xd   : > { %s134_s14 = scalar_lea.vmem %s246_s0, %s202_s11  ;;  %s138_s19 = scalar_lea.vmem %s248_s2, %s202_s11 }
   0xe   : > { %v139_v0 = vld [vmem:[%s134_s14] sm:$0xff] }
   0xf   : > { %v140_v2 = vmul.f32 5.656854, %v139_v0 }
  0x11   : > { %v142_v3 = vadd.f32 %v141_v1, %v140_v2 }
  0x13   : > { %143 = vst [vmem:[%s138_s19] sm:$0xff] %v142_v3 }
  0x14 PF: > { %s12_s9 = sadd.s32 1, %s220_s9  }
  0x15   : > { %p9_p4 = scmp.ge.s32.totalorder %s12_s9, 4  }
  0x17   :  { %11 = sbr.rel (!%p9_p4) target bundleno = 1 (0x1), region = 58 }

// kernel: transformer_forward.52
= control target key start
LH: loop header
LB: loop body
LE: loop exit
PB: predicated region body
PF: predicated region fallthrough
CT: control target
= control target key end

     0   :  { %s469_s15 = smov 0   ;;  %s543_s0 = inlined_call_operand.vmem [shape: f32[8,8,128], index: 0, kind: input, shape index: {}]   ;;  %s544_s1 = inlined_call_operand.vmem [shape: f32[8,128,128], index: 1, kind: input, shape index: {}]   ;;  %s545_s2 = inlined_call_operand.vmem [shape: f32[8,128,128], index: 2, kind: input, shape index: {}]   ;;  %s546_s3 = inlined_call_operand.vmem [shape: f32[8,128], index: 3, kind: input, shape index: {}]   ;;  %s547_s4 = inlined_call_operand.vmem [shape: f32[8,8,128], index: 4, kind: output, shape index: {}]  }
   0x1 LB: > { %s409_s16 = sadd.s32 4294967295, %s442_s15   ;;  %p413_p0 = scmp.ge.s32.totalorder %s442_s15, 1  ;;  %s442_s15 = sphi %s469_s15, %s14_s15  }
   0x2   : > { %p181_p1 = scmp.lt.s32.totalorder %s442_s15, 9 }
   0x4   : > { %p182_p2 = pnand %p413_p0, %p181_p1 }
   0x5   : > { %p215_p3 = scmp.lt.s32.totalorder (!%p182_p2), %s409_s16, 7 }
   0x6   : > { %185 = sbr.rel (%p182_p2) target bundleno = 471 (0x1d7), region = 36 }
   0xb   : > { %s549_s16 = smov (!%p215_p3, %s409_s16), 7  ;;  %v287_v28 = vld [vmem:[%s546_s3] sm:$0xff] }
   0xc   : > { %s422_s17 = sshll.u32 %s549_s16, 7  ;;  %s414_s21 = sshll.u32 %s549_s16, 3 }
   0xd   : > { %s485_s20 = scalar_lea.vmem %s544_s1, %s422_s17  ;;  %s218_s24 = scalar_lea.vmem %s543_s0, %s414_s21 }
   0xe   : > { %v249_v0 = vld [vmem:[%s485_s20 + $0x78] sm:$0xff]  ;;  %v248_v1 = vld [vmem:[%s485_s20 + $0x70] sm:$0xff]  ;;  %v247_v2 = vld [vmem:[%s485_s20 + $0x68] sm:$0xff]  ;;  %s514_s27 = scalar_lea.vmem %s545_s2, %s422_s17  ;;  %s232_s6 = scalar_lea.vmem %s547_s4, %s414_s21 }
   0xf   : > { %266 = vmatpush.xpose.msra.mxu0 %v249_v0  ;;  %v246_v3 = vld [vmem:[%s485_s20 + $0x60] sm:$0xff]  ;;  %v245_v4 = vld [vmem:[%s485_s20 + $0x58] sm:$0xff]  ;;  %v244_v5 = vld [vmem:[%s485_s20 + $0x50] sm:$0xff] }
  0x10   : > { %v243_v6 = vld [vmem:[%s485_s20 + $0x48] sm:$0xff]  ;;  %v242_v7 = vld [vmem:[%s485_s20 + $0x40] sm:$0xff]  ;;  %v241_v8 = vld [vmem:[%s485_s20 + $0x38] sm:$0xff] }
  0x11   : > { %v240_v9 = vld [vmem:[%s485_s20 + $0x30] sm:$0xff]  ;;  %v239_v10 = vld [vmem:[%s485_s20 + $0x28] sm:$0xff]  ;;  %v238_v11 = vld [vmem:[%s485_s20 + $0x20] sm:$0xff] }
  0x12   : > { %v237_v12 = vld [vmem:[%s485_s20 + $0x18] sm:$0xff]  ;;  %v236_v13 = vld [vmem:[%s485_s20 + $0x10] sm:$0xff]  ;;  %v235_v14 = vld [vmem:[%s485_s20 + $0x8] sm:$0xff] }
  0x13   : > { %267 = vmatpush.xpose.msra.mxu0 %v248_v1  ;;  %v234_v15 = vld [vmem:[%s485_s20] sm:$0xff]  ;;  %v265_v17 = vld [vmem:[%s514_s27 + $0x78] sm:$0xff]  ;;  %v264_v18 = vld [vmem:[%s514_s27 + $0x70] sm:$0xff] }
  0x14   : > { %v233_v16 = vld [vmem:[%s218_s24] sm:$0xff]  ;;  %296 = vmatpush.msra.mxu1 %v265_v17  ;;  %v263_v19 = vld [vmem:[%s514_s27 + $0x68] sm:$0xff]  ;;  %v261_v21 = vld [vmem:[%s514_s27 + $0x58] sm:$0xff] }
  0x15   : > { %v262_v20 = vld [vmem:[%s514_s27 + $0x60] sm:$0xff]  ;;  %v260_v22 = vld [vmem:[%s514_s27 + $0x50] sm:$0xff]  ;;  %v259_v23 = vld [vmem:[%s514_s27 + $0x48] sm:$0xff] }
  0x16   : > { %297 = vmatpush.msra.mxu1 %v264_v18  ;;  %v258_v24 = vld [vmem:[%s514_s27 + $0x40] sm:$0xff]  ;;  %v257_v25 = vld [vmem:[%s514_s27 + $0x38] sm:$0xff]  ;;  %v256_v26 = vld [vmem:[%s514_s27 + $0x30] sm:$0xff] }
  0x17   : > { %268 = vmatpush.xpose.msra.mxu0 %v247_v2  ;;  %v255_v31 = vld [vmem:[%s514_s27 + $0x28] sm:$0xff]  ;;  %v254_v32 = vld [vmem:[%s514_s27 + $0x20] sm:$0xff]  ;;  %v253_v33 = vld [vmem:[%s514_s27 + $0x18] sm:$0xff] }
  0x18   : > { %298 = vmatpush.msra.mxu1 %v263_v19  ;;  %v252_v34 = vld [vmem:[%s514_s27 + $0x10] sm:$0xff]  ;;  %v251_v35 = vld [vmem:[%s514_s27 + $0x8] sm:$0xff]  ;;  %v250_v36 = vld [vmem:[%s514_s27] sm:$0xff] }
  0x1a   : > { %299 = vmatpush.msra.mxu1 %v262_v20 }
  0x1b   : > { %269 = vmatpush.xpose.msra.mxu0 %v246_v3 }
  0x1c   : > { %300 = vmatpush.msra.mxu1 %v261_v21 }
  0x1e   : > { %301 = vmatpush.msra.mxu1 %v260_v22 }
  0x1f   : > { %270 = vmatpush.xpose.msra.mxu0 %v245_v4 }
  0x20   : > { %302 = vmatpush.msra.mxu1 %v259_v23 }
  0x22   : > { %303 = vmatpush.msra.mxu1 %v258_v24 }
  0x23   : > { %271 = vmatpush.xpose.msra.mxu0 %v244_v5 }
  0x24   : > { %304 = vmatpush.msra.mxu1 %v257_v25 }
  0x26   : > { %305 = vmatpush.msra.mxu1 %v256_v26 }
  0x27   : > { %272 = vmatpush.xpose.msra.mxu0 %v243_v6 }
  0x28   : > { %306 = vmatpush.msra.mxu1 %v255_v31 }
  0x2a   : > { %307 = vmatpush.msra.mxu1 %v254_v32 }
  0x2b   : > { %273 = vmatpush.xpose.msra.mxu0 %v242_v7 }
  0x2c   : > { %308 = vmatpush.msra.mxu1 %v253_v33 }
  0x2e   : > { %309 = vmatpush.msra.mxu1 %v252_v34 }
  0x2f   : > { %274 = vmatpush.xpose.msra.mxu0 %v241_v8 }
  0x30   : > { %310 = vmatpush.msra.mxu1 %v251_v35 }
  0x32   : > { %311 = vmatpush.msra.mxu1 %v250_v36 }
  0x33   : > { %275 = vmatpush.xpose.msra.mxu0 %v240_v9 }
  0x37   : > { %276 = vmatpush.xpose.msra.mxu0 %v239_v10 }
  0x3b   : > { %277 = vmatpush.xpose.msra.mxu0 %v238_v11 }
  0x3f   : > { %278 = vmatpush.xpose.msra.mxu0 %v237_v12 }
  0x43   : > { %279 = vmatpush.xpose.msra.mxu0 %v236_v13 }
  0x47   : > { %280 = vmatpush.xpose.msra.mxu0 %v235_v14 }
  0x4b   : > { %281 = vmatpush.xpose.msra.mxu0 %v234_v15 }
  0x4e   : > { %282 = vmatmul.f32.vlgmr.msra.gmra.mxu0 %v233_v16 }
  0xcb   : > { %v283_v27 = vpop.f32.mrf.mxu0 }
  0xcc   : > { %v286_v29 = vmul.f32 0.35355338, %v283_v27 }
  0xce   : > { %v288_v30 = vadd.f32 %v287_v28, %v286_v29 }
  0xd0   : > { %289 = vmax.xlane.f32.xlu0 %v288_v30 }
 0x143   : > { %v290_v37 = vpop.xlane.xlu0 %289 }
 0x144   : > { %v291_v38 = vsub.f32 %v288_v30, %v290_v37 }
 0x146   : > { %v292_v39 = vmul.f32 1.442695, %v291_v38 }
 0x148   : > { %432 = vpow2.f32 %v292_v39 }
 0x14e   : > { %v433_v40 = vpop.eup %432 }
 0x14f   : > { %294 = vadd.xlane.f32.xlu0 %v433_v40  ;;  %312 = vmatmul.f32.vlgmr.msra.gmra.mxu1 %v433_v40 }
 0x1c2   : > { %v295_v41 = vpop.xlane.xlu0 %294 }
 0x1c3   : > { %434 = vrcp.f32 %v295_v41  ;;  %v327_v45 = vand.u32 2147483648, %v295_v41  ;;  %v325_v47 = vand.u32 2147483647, %v295_v41  ;;  %vm321_vm1 = vweird.f32 %v295_v41 }
 0x1c5   : > { %v328_v49 = vor.u32 1.1754944e-38, %v327_v45  ;;  %vm326_vm3 = vcmp.eq.f32.partialorder %v325_v47, 8.507059e+37 }
 0x1c9   : > { %v435_v42 = vpop.eup %434 }
 0x1ca   : > { %v317_v43 = vmul.f32 %v435_v42, %v295_v41  ;;  %vm322_vm0 = vweird.f32 %v435_v42 }
 0x1cb   : > { %vm323_vm2 = vmor %vm321_vm1, %vm322_vm0 }
 0x1cc   : > { %v318_v44 = vsub.f32 1.0, %v317_v43  ;;  %v313_v51 = vpop.f32.mrf.mxu1 }
 0x1ce   : > { %v319_v46 = vmul.f32 %v435_v42, %v318_v44 }
 0x1d0   : > { %v320_v48 = vadd.f32 %v435_v42, %v319_v46 }
 0x1d2   : > { %v324_v50 = vsel %vm323_vm2, %v435_v42, %v320_v48 }
 0x1d3   : > { %v329_v52 = vsel %vm326_vm3, %v328_v49, %v324_v50 }
 0x1d4   : > { %v330_v53 = vmul.f32 %v329_v52, %v313_v51 }
 0x1d6   : > { %331 = vst [vmem:[%s232_s6] sm:$0xff] %v330_v53 }
 0x1d7 PF: > { %s14_s15 = sadd.s32 1, %s442_s15  }
 0x1d8   : > { %p11_p4 = scmp.ge.s32.totalorder %s14_s15, 10  }
 0x1da   :  { %13 = sbr.rel (!%p11_p4) target bundleno = 1 (0x1), region = 72 }

// kernel: transformer_forward.54
= control target key start
LH: loop header
LB: loop body
LE: loop exit
PB: predicated region body
PF: predicated region fallthrough
CT: control target
= control target key end

     0   :  { %v23_v6 = vlaneseq  ;;  %s141_s0 = inlined_call_operand.vmem [shape: f32[16,128], index: 0, kind: input, shape index: {}]   ;;  %s142_s1 = inlined_call_operand.vmem [shape: f32[16,128], index: 1, kind: input, shape index: {}]   ;;  %s143_s2 = inlined_call_operand.vmem [shape: f32[1,128], index: 2, kind: input, shape index: {}]   ;;  %s144_s3 = inlined_call_operand.vmem [shape: f32[1,128], index: 3, kind: input, shape index: {}]   ;;  %s145_s4 = inlined_call_operand.vmem [shape: f32[16,128], index: 4, kind: output, shape index: {}]  }
   0x1   :  { %v17_v0 = vld [vmem:[%s141_s0] sm:$0xff]  ;;  %v18_v3 = vld [vmem:[%s141_s0 + $0x8] sm:$0xff] }
   0x2   :  { %v19_v1 = vld [vmem:[%s142_s1] sm:$0xff]  ;;  %v20_v4 = vld [vmem:[%s142_s1 + $0x8] sm:$0xff]  ;;  %v24_v7 = vand.u32 127, %v23_v6 }
   0x3   :  { %v21_v2 = vadd.f32 %v19_v1, %v17_v0  ;;  %v22_v5 = vadd.f32 %v20_v4, %v18_v3  ;;  %v86_v32 = vld [vmem:[%s143_s2] ss:$0 sm:$0xff] }
   0x4   :  { %vm25_vm0 = vcmp.lt.s32.totalorder %v24_v7, 32  ;;  %v87_v35 = vld [vmem:[%s144_s3] ss:$0 sm:$0xff] }
   0x5   :  { %26 = vadd.xlane.f32.xlu0 %v21_v2 }
   0xd   :  { %28 = vadd.xlane.f32.xlu0 %v22_v5 }
  0x78   :  { %v27_v8 = vpop.xlane.xlu0 %26 }
  0x79   :  { %v30_v9 = vmul.f32 0.03125, %v27_v8 }
  0x7b   :  { %v32_v10 = vsub.f32 %v21_v2, %v30_v9 }
  0x7d   :  { %v34_v11 = vsel %vm25_vm0, %v32_v10, 0.0 }
  0x7e   :  { %v36_v12 = vmul.f32 %v34_v11, %v34_v11 }
  0x80   :  { %38 = vadd.xlane.f32.xlu1 %v36_v12  ;;  %v29_v13 = vpop.xlane.xlu0 %28 }
  0x81   :  { %v31_v14 = vmul.f32 0.03125, %v29_v13 }
  0x83   :  { %v33_v15 = vsub.f32 %v22_v5, %v31_v14 }
  0x85   :  { %v35_v16 = vsel %vm25_vm0, %v33_v15, 0.0 }
  0x86   :  { %v37_v17 = vmul.f32 %v35_v16, %v35_v16 }
  0x88   :  { %40 = vadd.xlane.f32.xlu1 %v37_v17 }
  0xf3   :  { %v39_v18 = vpop.xlane.xlu1 %38 }
  0xf4   :  { %v42_v19 = vmul.f32 0.03125, %v39_v18 }
  0xf6   :  { %v44_v20 = vadd.f32 1e-05, %v42_v19 }
  0xf8   :  { %88 = vrsqrt.f32 %v44_v20  ;;  %vm52_vm2 = vweird.f32 %v44_v20 }
  0xfb   :  { %v41_v21 = vpop.xlane.xlu1 %40 }
  0xfc   :  { %v43_v22 = vmul.f32 0.03125, %v41_v21 }
  0xfe   :  { %v89_v23 = vpop.eup %88  ;;  %v45_v24 = vadd.f32 1e-05, %v43_v22 }
  0xff   :  { %v47_v25 = vmul.f32 %v89_v23, %v44_v20  ;;  %vm53_vm1 = vweird.f32 %v89_v23 }
 0x100   :  { %90 = vrsqrt.f32 %v45_v24  ;;  %vm54_vm3 = vmor %vm52_vm2, %vm53_vm1  ;;  %vm62_vm5 = vweird.f32 %v45_v24 }
 0x101   :  { %v48_v26 = vmul.f32 %v89_v23, %v47_v25 }
 0x103   :  { %v49_v27 = vmul.f32 0.5, %v48_v26 }
 0x105   :  { %v50_v28 = vsub.f32 1.5, %v49_v27 }
 0x106   :  { %v91_v29 = vpop.eup %90 }
 0x107   :  { %v51_v30 = vmul.f32 %v89_v23, %v50_v28  ;;  %v57_v31 = vmul.f32 %v91_v29, %v45_v24  ;;  %vm63_vm4 = vweird.f32 %v91_v29 }
 0x108   :  { %vm64_vm6 = vmor %vm62_vm5, %vm63_vm4 }
 0x109   :  { %v55_v33 = vsel %vm54_vm3, %v89_v23, %v51_v30  ;;  %v58_v34 = vmul.f32 %v91_v29, %v57_v31 }
 0x10a   :  { %v66_v36 = vmul.f32 %v55_v33, %v34_v11 }
 0x10b   :  { %v59_v37 = vmul.f32 0.5, %v58_v34 }
 0x10c   :  { %v72_v38 = vmul.f32 %v86_v32, %v66_v36 }
 0x10d   :  { %v60_v39 = vsub.f32 1.5, %v59_v37 }
 0x10e   :  { %v78_v40 = vadd.f32 %v87_v35, %v72_v38 }
 0x10f   :  { %v61_v41 = vmul.f32 %v91_v29, %v60_v39 }
 0x110   :  { %80 = vst [vmem:[%s145_s4] sm:$0xff] %v78_v40 }
 0x111   :  { %v65_v42 = vsel %vm64_vm6, %v91_v29, %v61_v41 }
 0x112   :  { %v67_v43 = vmul.f32 %v65_v42, %v35_v16 }
 0x114   :  { %v73_v44 = vmul.f32 %v86_v32, %v67_v43 }
 0x116   :  { %v79_v45 = vadd.f32 %v87_v35, %v73_v44 }
 0x118   :  { %81 = vst [vmem:[%s145_s4 + $0x8] sm:$0xff] %v79_v45 }

// kernel: transformer_forward.37
= control target key start
LH: loop header
LB: loop body
LE: loop exit
PB: predicated region body
PF: predicated region fallthrough
CT: control target
= control target key end

     0   :  { %s234_s9 = smov 0   ;;  %s265_s0 = inlined_call_operand.vmem [shape: f32[2,16,128], index: 0, kind: input, shape index: {}]   ;;  %s266_s1 = inlined_call_operand.vmem [shape: f32[16,128], index: 1, kind: input, shape index: {}]   ;;  %s267_s2 = inlined_call_operand.vmem [shape: f32[2,16,128], index: 2, kind: output, shape index: {}]  }
   0x1 LB: > { %s209_s10 = sadd.s32 4294967295, %s236_s9   ;;  %p213_p0 = scmp.ge.s32.totalorder %s236_s9, 1  ;;  %s236_s9 = sphi %s234_s9, %s12_s9  }
   0x2   : > { %p112_p1 = scmp.lt.s32.totalorder %s236_s9, 3 }
   0x4   : > { %p113_p2 = pnand %p213_p0, %p112_p1 }
   0x5   : > { %p134_p3 = scmp.lt.s32.totalorder (!%p113_p2), %s209_s10, 1 }
   0x6   : > { %116 = sbr.rel (%p113_p2) target bundleno = 21 (0x15), region = 28 }
   0xb   : > { %s269_s10 = smov (!%p134_p3, %s209_s10), 1  ;;  %v148_v0 = vld [vmem:[%s266_s1] sm:$0xff]  ;;  %v149_v3 = vld [vmem:[%s266_s1 + $0x8] sm:$0xff] }
   0xc   : > { %s220_s11 = sshll.u32 %s269_s10, 4 }
   0xd   : > { %s138_s14 = scalar_lea.vmem %s265_s0, %s220_s11  ;;  %s143_s21 = scalar_lea.vmem %s267_s2, %s220_s11 }
   0xe   : > { %v144_v1 = vld [vmem:[%s138_s14] sm:$0xff]  ;;  %v145_v2 = vld [vmem:[%s138_s14 + $0x8] sm:$0xff] }
   0xf   : > { %v146_v4 = vmul.f32 5.656854, %v144_v1  ;;  %v147_v5 = vmul.f32 5.656854, %v145_v2 }
  0x11   : > { %v150_v6 = vadd.f32 %v148_v0, %v146_v4  ;;  %v151_v7 = vadd.f32 %v149_v3, %v147_v5 }
  0x13   : > { %152 = vst [vmem:[%s143_s21] sm:$0xff] %v150_v6 }
  0x14   : > { %153 = vst [vmem:[%s143_s21 + $0x8] sm:$0xff] %v151_v7 }
  0x15 PF: > { %s12_s9 = sadd.s32 1, %s236_s9  }
  0x16   : > { %p9_p4 = scmp.ge.s32.totalorder %s12_s9, 4  }
  0x18   :  { %11 = sbr.rel (!%p9_p4) target bundleno = 1 (0x1), region = 58 }

// kernel: transformer_forward.38
= control target key start
LH: loop header
LB: loop body
LE: loop exit
PB: predicated region body
PF: predicated region fallthrough
CT: control target
= control target key end

     0   :  { %s192_s1 = inlined_call_operand.vmem [shape: f32[128,128], index: 1, kind: input, shape index: {}]   ;;  %s193_s2 = inlined_call_operand.vmem [shape: f32[1,128], index: 2, kind: input, shape index: {}]   ;;  %s194_s0 = inlined_call_operand.vmem [shape: f32[24,128], index: 0, kind: input, shape index: {}]   ;;  %s195_s3 = inlined_call_operand.vmem [shape: f32[24,128], index: 3, kind: output, shape index: {}]  }
   0x1   :  { %v32_v0 = vld [vmem:[%s192_s1 + $0x78] sm:$0xff]  ;;  %v31_v1 = vld [vmem:[%s192_s1 + $0x70] sm:$0xff]  ;;  %v30_v2 = vld [vmem:[%s192_s1 + $0x68] sm:$0xff] }
   0x2   :  { %71 = vmatpush.msra.mxu2 %v32_v0  ;;  %37 = vmatpush.msra.mxu0 %v32_v0  ;;  %v29_v3 = vld [vmem:[%s192_s1 + $0x60] sm:$0xff]  ;;  %v28_v4 = vld [vmem:[%s192_s1 + $0x58] sm:$0xff]  ;;  %v27_v5 = vld [vmem:[%s192_s1 + $0x50] sm:$0xff] }
   0x3   :  { %70 = vmatpush.msra.mxu1 %v32_v0  ;;  %v26_v6 = vld [vmem:[%s192_s1 + $0x48] sm:$0xff]  ;;  %v25_v7 = vld [vmem:[%s192_s1 + $0x40] sm:$0xff]  ;;  %v24_v8 = vld [vmem:[%s192_s1 + $0x38] sm:$0xff] }
   0x4   :  { %73 = vmatpush.msra.mxu2 %v31_v1  ;;  %38 = vmatpush.msra.mxu0 %v31_v1  ;;  %v23_v9 = vld [vmem:[%s192_s1 + $0x30] sm:$0xff]  ;;  %v22_v10 = vld [vmem:[%s192_s1 + $0x28] sm:$0xff]  ;;  %v21_v11 = vld [vmem:[%s192_s1 + $0x20] sm:$0xff] }
   0x5   :  { %72 = vmatpush.msra.mxu1 %v31_v1  ;;  %v20_v12 = vld [vmem:[%s192_s1 + $0x18] sm:$0xff]  ;;  %v19_v13 = vld [vmem:[%s192_s1 + $0x10] sm:$0xff]  ;;  %v18_v14 = vld [vmem:[%s192_s1 + $0x8] sm:$0xff] }
   0x6   :  { %75 = vmatpush.msra.mxu2 %v30_v2  ;;  %39 = vmatpush.msra.mxu0 %v30_v2  ;;  %v17_v15 = vld [vmem:[%s192_s1] sm:$0xff]  ;;  %v16_v16 = vld [vmem:[%s194_s0 + $0x10] sm:$0xff]  ;;  %v15_v18 = vld [vmem:[%s194_s0 + $0x8] sm:$0xff] }
   0x7   :  { %74 = vmatpush.msra.mxu1 %v30_v2  ;;  %v14_v17 = vld [vmem:[%s194_s0] sm:$0xff] }
   0x8   :  { %77 = vmatpush.msra.mxu2 %v29_v3  ;;  %40 = vmatpush.msra.mxu0 %v29_v3  ;;  %v102_v19 = vld [vmem:[%s193_s2] ss:$0 sm:$0xff] }
   0x9   :  { %76 = vmatpush.msra.mxu1 %v29_v3 }
   0xa   :  { %79 = vmatpush.msra.mxu2 %v28_v4  ;;  %41 = vmatpush.msra.mxu0 %v28_v4 }
   0xb   :  { %78 = vmatpush.msra.mxu1 %v28_v4 }
   0xc   :  { %81 = vmatpush.msra.mxu2 %v27_v5  ;;  %42 = vmatpush.msra.mxu0 %v27_v5 }
   0xd   :  { %80 = vmatpush.msra.mxu1 %v27_v5 }
   0xe   :  { %83 = vmatpush.msra.mxu2 %v26_v6  ;;  %43 = vmatpush.msra.mxu0 %v26_v6 }
   0xf   :  { %82 = vmatpush.msra.mxu1 %v26_v6 }
  0x10   :  { %85 = vmatpush.msra.mxu2 %v25_v7  ;;  %44 = vmatpush.msra.mxu0 %v25_v7 }
  0x11   :  { %84 = vmatpush.msra.mxu1 %v25_v7 }
  0x12   :  { %87 = vmatpush.msra.mxu2 %v24_v8  ;;  %45 = vmatpush.msra.mxu0 %v24_v8 }
  0x13   :  { %86 = vmatpush.msra.mxu1 %v24_v8 }
  0x14   :  { %89 = vmatpush.msra.mxu2 %v23_v9  ;;  %46 = vmatpush.msra.mxu0 %v23_v9 }
  0x15   :  { %88 = vmatpush.msra.mxu1 %v23_v9 }
  0x16   :  { %91 = vmatpush.msra.mxu2 %v22_v10  ;;  %47 = vmatpush.msra.mxu0 %v22_v10 }
  0x17   :  { %90 = vmatpush.msra.mxu1 %v22_v10 }
  0x18   :  { %93 = vmatpush.msra.mxu2 %v21_v11  ;;  %48 = vmatpush.msra.mxu0 %v21_v11 }
  0x19   :  { %92 = vmatpush.msra.mxu1 %v21_v11 }
  0x1a   :  { %95 = vmatpush.msra.mxu2 %v20_v12  ;;  %49 = vmatpush.msra.mxu0 %v20_v12 }
  0x1b   :  { %94 = vmatpush.msra.mxu1 %v20_v12 }
  0x1c   :  { %97 = vmatpush.msra.mxu2 %v19_v13  ;;  %50 = vmatpush.msra.mxu0 %v19_v13 }
  0x1d   :  { %96 = vmatpush.msra.mxu1 %v19_v13 }
  0x1e   :  { %99 = vmatpush.msra.mxu2 %v18_v14  ;;  %51 = vmatpush.msra.mxu0 %v18_v14 }
  0x1f   :  { %98 = vmatpush.msra.mxu1 %v18_v14 }
  0x20   :  { %101 = vmatpush.msra.mxu2 %v17_v15  ;;  %52 = vmatpush.msra.mxu0 %v17_v15 }
  0x21   :  { %59 = vmatmul.f32.vlgmr.msra.gmra.mxu2 %v16_v16  ;;  %100 = vmatpush.msra.mxu1 %v17_v15 }
  0x22   :  { %53 = vmatmul.f32.vlgmr.msra.gmra.mxu0 %v14_v17  ;;  %56 = vmatmul.f32.vlgmr.msra.gmra.mxu1 %v15_v18 }
  0x9f   :  { %v54_v20 = vpop.f32.mrf.mxu0  ;;  %v57_v21 = vpop.f32.mrf.mxu1 }
  0xa0   :  { %v55_v22 = vadd.f32 %v102_v19, %v54_v20  ;;  %v58_v23 = vadd.f32 %v102_v19, %v57_v21 }
  0xa2   :  { %63 = vst [vmem:[%s195_s3] sm:$0xff] %v55_v22 }
  0xa3   :  { %64 = vst [vmem:[%s195_s3 + $0x8] sm:$0xff] %v58_v23 }
  0xa4   :  { %v60_v24 = vpop.f32.mrf.mxu2 }
  0xa5   :  { %v61_v25 = vadd.f32 %v102_v19, %v60_v24 }
  0xa7   :  { %65 = vst [vmem:[%s195_s3 + $0x10] sm:$0xff] %v61_v25 }

// kernel: transformer_forward.39
= control target key start
LH: loop header
LB: loop body
LE: loop exit
PB: predicated region body
PF: predicated region fallthrough
CT: control target
= control target key end

     0   :  { %s533_s15 = smov 0   ;;  %s610_s0 = inlined_call_operand.vmem [shape: f32[8,16,128], index: 0, kind: input, shape index: {}]   ;;  %s611_s1 = inlined_call_operand.vmem [shape: f32[8,128,128], index: 1, kind: input, shape index: {}]   ;;  %s612_s2 = inlined_call_operand.vmem [shape: f32[8,128,128], index: 2, kind: input, shape index: {}]   ;;  %s613_s3 = inlined_call_operand.vmem [shape: f32[16,128], index: 3, kind: input, shape index: {}]   ;;  %s614_s4 = inlined_call_operand.vmem [shape: f32[8,16,128], index: 4, kind: output, shape index: {}]  }
   0x1 LB: > { %s449_s16 = sadd.s32 4294967295, %s506_s15   ;;  %p453_p0 = scmp.ge.s32.totalorder %s506_s15, 1  ;;  %s506_s15 = sphi %s533_s15, %s14_s15  }
   0x2   : > { %p182_p1 = scmp.lt.s32.totalorder %s506_s15, 9 }
   0x4   : > { %p183_p2 = pnand %p453_p0, %p182_p1 }
   0x5   : > { %p218_p3 = scmp.lt.s32.totalorder (!%p183_p2), %s449_s16, 7 }
   0x6   : > { %186 = sbr.rel (%p183_p2) target bundleno = 479 (0x1df), region = 36 }
   0xb   : > { %s616_s16 = smov (!%p218_p3, %s449_s16), 7  ;;  %v297_v29 = vld [vmem:[%s613_s3] sm:$0xff]  ;;  %v298_v33 = vld [vmem:[%s613_s3 + $0x8] sm:$0xff] }
   0xc   : > { %s465_s17 = sshll.u32 %s616_s16, 7  ;;  %s464_s21 = sshll.u32 %s616_s16, 4 }
   0xd   : > { %s549_s20 = scalar_lea.vmem %s611_s1, %s465_s17  ;;  %s222_s24 = scalar_lea.vmem %s610_s0, %s464_s21 }
   0xe   : > { %v255_v0 = vld [vmem:[%s549_s20 + $0x78] sm:$0xff]  ;;  %v254_v1 = vld [vmem:[%s549_s20 + $0x70] sm:$0xff]  ;;  %v253_v2 = vld [vmem:[%s549_s20 + $0x68] sm:$0xff]  ;;  %s578_s27 = scalar_lea.vmem %s612_s2, %s465_s17  ;;  %s237_s8 = scalar_lea.vmem %s614_s4, %s464_s21 }
   0xf   : > { %272 = vmatpush.xpose.msra.mxu0 %v255_v0  ;;  %468 = vmatpush.xpose.msra.mxu2 %v255_v0  ;;  %v252_v3 = vld [vmem:[%s549_s20 + $0x60] sm:$0xff]  ;;  %v251_v4 = vld [vmem:[%s549_s20 + $0x58] sm:$0xff]  ;;  %v250_v5 = vld [vmem:[%s549_s20 + $0x50] sm:$0xff] }
  0x10   : > { %v249_v6 = vld [vmem:[%s549_s20 + $0x48] sm:$0xff]  ;;  %v248_v7 = vld [vmem:[%s549_s20 + $0x40] sm:$0xff]  ;;  %v247_v8 = vld [vmem:[%s549_s20 + $0x38] sm:$0xff] }
  0x11   : > { %v246_v9 = vld [vmem:[%s549_s20 + $0x30] sm:$0xff]  ;;  %v245_v10 = vld [vmem:[%s549_s20 + $0x28] sm:$0xff]  ;;  %v244_v11 = vld [vmem:[%s549_s20 + $0x20] sm:$0xff] }
  0x12   : > { %v243_v12 = vld [vmem:[%s549_s20 + $0x18] sm:$0xff]  ;;  %v242_v13 = vld [vmem:[%s549_s20 + $0x10] sm:$0xff]  ;;  %v241_v14 = vld [vmem:[%s549_s20 + $0x8] sm:$0xff] }
  0x13   : > { %273 = vmatpush.xpose.msra.mxu0 %v254_v1  ;;  %469 = vmatpush.xpose.msra.mxu2 %v254_v1  ;;  %v240_v15 = vld [vmem:[%s549_s20] sm:$0xff]  ;;  %v239_v17 = vld [vmem:[%s222_s24 + $0x8] sm:$0xff]  ;;  %v271_v18 = vld [vmem:[%s578_s27 + $0x78] sm:$0xff] }
  0x14   : > { %v238_v16 = vld [vmem:[%s222_s24] sm:$0xff]  ;;  %v270_v19 = vld [vmem:[%s578_s27 + $0x70] sm:$0xff]  ;;  %315 = vmatpush.msra.mxu1 %v271_v18  ;;  %v269_v20 = vld [vmem:[%s578_s27 + $0x68] sm:$0xff] }
  0x15   : > { %v268_v21 = vld [vmem:[%s578_s27 + $0x60] sm:$0xff]  ;;  %v267_v22 = vld [vmem:[%s578_s27 + $0x58] sm:$0xff]  ;;  %v266_v23 = vld [vmem:[%s578_s27 + $0x50] sm:$0xff] }
  0x16   : > { %316 = vmatpush.msra.mxu1 %v270_v19  ;;  %v265_v24 = vld [vmem:[%s578_s27 + $0x48] sm:$0xff]  ;;  %v264_v25 = vld [vmem:[%s578_s27 + $0x40] sm:$0xff]  ;;  %v263_v26 = vld [vmem:[%s578_s27 + $0x38] sm:$0xff] }
  0x17   : > { %274 = vmatpush.xpose.msra.mxu0 %v253_v2  ;;  %470 = vmatpush.xpose.msra.mxu2 %v253_v2  ;;  %v262_v27 = vld [vmem:[%s578_s27 + $0x30] sm:$0xff]  ;;  %v261_v36 = vld [vmem:[%s578_s27 + $0x28] sm:$0xff]  ;;  %v260_v37 = vld [vmem:[%s578_s27 + $0x20] sm:$0xff] }
  0x18   : > { %317 = vmatpush.msra.mxu1 %v269_v20  ;;  %v259_v38 = vld [vmem:[%s578_s27 + $0x18] sm:$0xff]  ;;  %v258_v39 = vld [vmem:[%s578_s27 + $0x10] sm:$0xff]  ;;  %v257_v40 = vld [vmem:[%s578_s27 + $0x8] sm:$0xff] }
  0x19   : > { %v256_v41 = vld [vmem:[%s578_s27] sm:$0xff] }
  0x1a   : > { %318 = vmatpush.msra.mxu1 %v268_v21 }
  0x1b   : > { %275 = vmatpush.xpose.msra.mxu0 %v252_v3  ;;  %471 = vmatpush.xpose.msra.mxu2 %v252_v3 }
  0x1c   : > { %319 = vmatpush.msra.mxu1 %v267_v22 }
  0x1e   : > { %320 = vmatpush.msra.mxu1 %v266_v23 }
  0x1f   : > { %276 = vmatpush.xpose.msra.mxu0 %v251_v4  ;;  %472 = vmatpush.xpose.msra.mxu2 %v251_v4 }
  0x20   : > { %321 = vmatpush.msra.mxu1 %v265_v24 }
  0x22   : > { %322 = vmatpush.msra.mxu1 %v264_v25 }
  0x23   : > { %277 = vmatpush.xpose.msra.mxu0 %v250_v5  ;;  %473 = vmatpush.xpose.msra.mxu2 %v250_v5 }
  0x24   : > { %323 = vmatpush.msra.mxu1 %v263_v26 }
  0x26   : > { %324 = vmatpush.msra.mxu1 %v262_v27 }
  0x27   : > { %278 = vmatpush.xpose.msra.mxu0 %v249_v6  ;;  %474 = vmatpush.xpose.msra.mxu2 %v249_v6 }
  0x28   : > { %325 = vmatpush.msra.mxu1 %v261_v36 }
  0x2a   : > { %326 = vmatpush.msra.mxu1 %v260_v37 }
  0x2b   : > { %279 = vmatpush.xpose.msra.mxu0 %v248_v7  ;;  %475 = vmatpush.xpose.msra.mxu2 %v248_v7 }
  0x2c   : > { %327 = vmatpush.msra.mxu1 %v259_v38 }
  0x2e   : > { %328 = vmatpush.msra.mxu1 %v258_v39 }
  0x2f   : > { %280 = vmatpush.xpose.msra.mxu0 %v247_v8  ;;  %476 = vmatpush.xpose.msra.mxu2 %v247_v8 }
  0x30   : > { %329 = vmatpush.msra.mxu1 %v257_v40 }
  0x32   : > { %330 = vmatpush.msra.mxu1 %v256_v41 }
  0x33   : > { %281 = vmatpush.xpose.msra.mxu0 %v246_v9  ;;  %477 = vmatpush.xpose.msra.mxu2 %v246_v9 }
  0x37   : > { %282 = vmatpush.xpose.msra.mxu0 %v245_v10  ;;  %478 = vmatpush.xpose.msra.mxu2 %v245_v10 }
  0x3b   : > { %283 = vmatpush.xpose.msra.mxu0 %v244_v11  ;;  %479 = vmatpush.xpose.msra.mxu2 %v244_v11 }
  0x3f   : > { %284 = vmatpush.xpose.msra.mxu0 %v243_v12  ;;  %480 = vmatpush.xpose.msra.mxu2 %v243_v12 }
  0x43   : > { %285 = vmatpush.xpose.msra.mxu0 %v242_v13  ;;  %481 = vmatpush.xpose.msra.mxu2 %v242_v13 }
  0x47   : > { %286 = vmatpush.xpose.msra.mxu0 %v241_v14  ;;  %482 = vmatpush.xpose.msra.mxu2 %v241_v14 }
  0x4b   : > { %287 = vmatpush.xpose.msra.mxu0 %v240_v15  ;;  %483 = vmatpush.xpose.msra.mxu2 %v240_v15 }
  0x4e   : > { %288 = vmatmul.f32.vlgmr.msra.gmra.mxu0 %v238_v16  ;;  %291 = vmatmul.f32.vlgmr.msra.gmra.mxu2 %v239_v17 }
  0xcb   : > { %v289_v28 = vpop.f32.mrf.mxu0 }
  0xcc   : > { %v295_v30 = vmul.f32 0.35355338, %v289_v28 }
  0xce   : > { %v299_v31 = vadd.f32 %v297_v29, %v295_v30 }
  0xd0   : > { %301 = vmax.xlane.f32.xlu0 %v299_v31 }
  0xd1   : > { %v292_v32 = vpop.f32.mrf.mxu2 }
  0xd2   : > { %v296_v34 = vmul.f32 0.35355338, %v292_v32 }
  0xd4   : > { %v300_v35 = vadd.f32 %v298_v33, %v296_v34 }
  0xd8   : > { %303 = vmax.xlane.f32.xlu0 %v300_v35 }
 0x143   : > { %v302_v42 = vpop.xlane.xlu0 %301 }
 0x144   : > { %v305_v43 = vsub.f32 %v299_v31, %v302_v42 }
 0x146   : > { %v307_v44 = vmul.f32 1.442695, %v305_v43 }
 0x148   : > { %492 = vpow2.f32 %v307_v44 }
 0x14b   : > { %v304_v45 = vpop.xlane.xlu0 %303 }
 0x14c   : > { %v306_v46 = vsub.f32 %v300_v35, %v304_v45 }
 0x14e   : > { %v493_v47 = vpop.eup %492  ;;  %v309_v48 = vmul.f32 1.442695, %v306_v46 }
 0x14f   : > { %311 = vadd.xlane.f32.xlu1 %v493_v47  ;;  %331 = vmatmul.f32.vlgmr.msra.gmra.mxu1 %v493_v47 }
 0x150   : > { %494 = vpow2.f32 %v309_v48 }
 0x156   : > { %v495_v49 = vpop.eup %494 }
 0x157   : > { %313 = vadd.xlane.f32.xlu1 %v495_v49  ;;  %334 = vmatmul.f32.gmra.mxu1 %v495_v49 }
 0x1c2   : > { %v312_v50 = vpop.xlane.xlu1 %311 }
 0x1c3   : > { %496 = vrcp.f32 %v312_v50  ;;  %v349_v55 = vand.u32 2147483648, %v312_v50  ;;  %v347_v57 = vand.u32 2147483647, %v312_v50  ;;  %vm343_vm1 = vweird.f32 %v312_v50 }
 0x1c5   : > { %v350_v61 = vor.u32 1.1754944e-38, %v349_v55  ;;  %vm348_vm3 = vcmp.eq.f32.partialorder %v347_v57, 8.507059e+37 }
 0x1c9   : > { %v497_v51 = vpop.eup %496 }
 0x1ca   : > { %v339_v52 = vmul.f32 %v497_v51, %v312_v50  ;;  %v314_v53 = vpop.xlane.xlu1 %313  ;;  %vm344_vm0 = vweird.f32 %v497_v51 }
 0x1cb   : > { %498 = vrcp.f32 %v314_v53  ;;  %vm345_vm2 = vmor %vm343_vm1, %vm344_vm0  ;;  %v364_v3 = vand.u32 2147483648, %v314_v53  ;;  %v362_v5 = vand.u32 2147483647, %v314_v53  ;;  %vm358_vm5 = vweird.f32 %v314_v53 }
 0x1cc   : > { %v340_v54 = vsub.f32 1.0, %v339_v52  ;;  %v332_v60 = vpop.f32.mrf.mxu1 }
 0x1cd   : > { %v365_v7 = vor.u32 1.1754944e-38, %v364_v3  ;;  %vm363_vm7 = vcmp.eq.f32.partialorder %v362_v5, 8.507059e+37 }
 0x1ce   : > { %v341_v56 = vmul.f32 %v497_v51, %v340_v54 }
 0x1d0   : > { %v342_v58 = vadd.f32 %v497_v51, %v341_v56 }
 0x1d1   : > { %v499_v59 = vpop.eup %498 }
 0x1d2   : > { %v354_v62 = vmul.f32 %v499_v59, %v314_v53  ;;  %v346_v63 = vsel %vm345_vm2, %v497_v51, %v342_v58  ;;  %vm359_vm4 = vweird.f32 %v499_v59 }
 0x1d3   : > { %v351_v0 = vsel %vm348_vm3, %v350_v61, %v346_v63  ;;  %vm360_vm6 = vmor %vm358_vm5, %vm359_vm4 }
 0x1d4   : > { %v355_v1 = vsub.f32 1.0, %v354_v62  ;;  %v352_v2 = vmul.f32 %v351_v0, %v332_v60  ;;  %v335_v9 = vpop.f32.mrf.mxu1 }
 0x1d6   : > { %v356_v4 = vmul.f32 %v499_v59, %v355_v1  ;;  %368 = vst [vmem:[%s237_s8] sm:$0xff] %v352_v2 }
 0x1d8   : > { %v357_v6 = vadd.f32 %v499_v59, %v356_v4 }
 0x1da   : > { %v361_v8 = vsel %vm360_vm6, %v499_v59, %v357_v6 }
 0x1db   : > { %v366_v10 = vsel %vm363_vm7, %v365_v7, %v361_v8 }
 0x1dc   : > { %v367_v11 = vmul.f32 %v366_v10, %v335_v9 }
 0x1de   : > { %369 = vst [vmem:[%s237_s8 + $0x8] sm:$0xff] %v367_v11 }
 0x1df PF: > { %s14_s15 = sadd.s32 1, %s506_s15  }
 0x1e0   : > { %p11_p4 = scmp.ge.s32.totalorder %s14_s15, 10  }
 0x1e2   :  { %13 = sbr.rel (!%p11_p4) target bundleno = 1 (0x1), region = 72 }

// kernel: transformer_forward.41
= control target key start
LH: loop header
LB: loop body
LE: loop exit
PB: predicated region body
PF: predicated region fallthrough
CT: control target
= control target key end

     0   :  { %v26_v9 = vlaneseq  ;;  %s179_s0 = inlined_call_operand.vmem [shape: f32[24,128], index: 0, kind: input, shape index: {}]   ;;  %s180_s1 = inlined_call_operand.vmem [shape: f32[24,128], index: 1, kind: input, shape index: {}]   ;;  %s181_s2 = inlined_call_operand.vmem [shape: f32[1,128], index: 2, kind: input, shape index: {}]   ;;  %s182_s3 = inlined_call_operand.vmem [shape: f32[1,128], index: 3, kind: input, shape index: {}]   ;;  %s183_s4 = inlined_call_operand.vmem [shape: f32[24,128], index: 4, kind: output, shape index: {}]  }
   0x1   :  { %v17_v0 = vld [vmem:[%s179_s0] sm:$0xff]  ;;  %v19_v3 = vld [vmem:[%s179_s0 + $0x10] sm:$0xff]  ;;  %v18_v6 = vld [vmem:[%s179_s0 + $0x8] sm:$0xff] }
   0x2   :  { %v20_v1 = vld [vmem:[%s180_s1] sm:$0xff]  ;;  %v22_v4 = vld [vmem:[%s180_s1 + $0x10] sm:$0xff]  ;;  %v21_v7 = vld [vmem:[%s180_s1 + $0x8] sm:$0xff]  ;;  %v27_v10 = vand.u32 127, %v26_v9 }
   0x3   :  { %v23_v2 = vadd.f32 %v20_v1, %v17_v0  ;;  %v25_v5 = vadd.f32 %v22_v4, %v19_v3  ;;  %v24_v8 = vadd.f32 %v21_v7, %v18_v6  ;;  %v113_v43 = vld [vmem:[%s181_s2] ss:$0 sm:$0xff] }
   0x4   :  { %vm28_vm0 = vcmp.lt.s32.totalorder %v27_v10, 32  ;;  %v114_v46 = vld [vmem:[%s182_s3] ss:$0 sm:$0xff] }
   0x5   :  { %29 = vadd.xlane.f32.xlu0 %v23_v2  ;;  %33 = vadd.xlane.f32.xlu1 %v25_v5 }
   0xd   :  { %31 = vadd.xlane.f32.xlu0 %v24_v8 }
  0x78   :  { %v30_v11 = vpop.xlane.xlu0 %29  ;;  %v34_v16 = vpop.xlane.xlu1 %33 }
  0x79   :  { %v35_v12 = vmul.f32 0.03125, %v30_v11  ;;  %v37_v19 = vmul.f32 0.03125, %v34_v16 }
  0x7b   :  { %v38_v13 = vsub.f32 %v23_v2, %v35_v12  ;;  %v40_v21 = vsub.f32 %v25_v5, %v37_v19 }
  0x7d   :  { %v41_v14 = vsel %vm28_vm0, %v38_v13, 0.0  ;;  %v43_v24 = vsel %vm28_vm0, %v40_v21, 0.0 }
  0x7e   :  { %v44_v15 = vmul.f32 %v41_v14, %v41_v14  ;;  %v46_v25 = vmul.f32 %v43_v24, %v43_v24 }
  0x80   :  { %47 = vadd.xlane.f32.xlu1 %v44_v15  ;;  %v32_v17 = vpop.xlane.xlu0 %31 }
  0x81   :  { %v36_v18 = vmul.f32 0.03125, %v32_v17 }
  0x83   :  { %v39_v20 = vsub.f32 %v24_v8, %v36_v18 }
  0x85   :  { %v42_v22 = vsel %vm28_vm0, %v39_v20, 0.0 }
  0x86   :  { %v45_v23 = vmul.f32 %v42_v22, %v42_v22 }
  0x88   :  { %49 = vadd.xlane.f32.xlu2 %v45_v23 }
  0x90   :  { %51 = vadd.xlane.f32.xlu2 %v46_v25 }
  0xf3   :  { %v48_v26 = vpop.xlane.xlu1 %47 }
  0xf4   :  { %v53_v27 = vmul.f32 0.03125, %v48_v26 }
  0xf6   :  { %v56_v28 = vadd.f32 1e-05, %v53_v27 }
  0xf8   :  { %115 = vrsqrt.f32 %v56_v28  ;;  %vm65_vm2 = vweird.f32 %v56_v28 }
  0xfb   :  { %v50_v29 = vpop.xlane.xlu2 %49 }
  0xfc   :  { %v54_v30 = vmul.f32 0.03125, %v50_v29 }
  0xfe   :  { %v116_v31 = vpop.eup %115  ;;  %v57_v32 = vadd.f32 1e-05, %v54_v30 }
  0xff   :  { %v60_v33 = vmul.f32 %v116_v31, %v56_v28  ;;  %vm66_vm1 = vweird.f32 %v116_v31 }
 0x100   :  { %117 = vrsqrt.f32 %v57_v32  ;;  %vm67_vm3 = vmor %vm65_vm2, %vm66_vm1  ;;  %vm75_vm5 = vweird.f32 %v57_v32 }
 0x101   :  { %v61_v34 = vmul.f32 %v116_v31, %v60_v33 }
 0x103   :  { %v62_v35 = vmul.f32 0.5, %v61_v34  ;;  %v52_v36 = vpop.xlane.xlu2 %51 }
 0x104   :  { %v55_v37 = vmul.f32 0.03125, %v52_v36 }
 0x105   :  { %v63_v38 = vsub.f32 1.5, %v62_v35 }
 0x106   :  { %v118_v39 = vpop.eup %117  ;;  %v58_v40 = vadd.f32 1e-05, %v55_v37 }
 0x107   :  { %v64_v41 = vmul.f32 %v116_v31, %v63_v38  ;;  %v70_v42 = vmul.f32 %v118_v39, %v57_v32  ;;  %vm76_vm4 = vweird.f32 %v118_v39 }
 0x108   :  { %119 = vrsqrt.f32 %v58_v40  ;;  %vm77_vm6 = vmor %vm75_vm5, %vm76_vm4  ;;  %vm85_vm8 = vweird.f32 %v58_v40 }
 0x109   :  { %v68_v44 = vsel %vm67_vm3, %v116_v31, %v64_v41  ;;  %v71_v45 = vmul.f32 %v118_v39, %v70_v42 }
 0x10a   :  { %v89_v47 = vmul.f32 %v68_v44, %v41_v14 }
 0x10b   :  { %v72_v48 = vmul.f32 0.5, %v71_v45 }
 0x10c   :  { %v96_v49 = vmul.f32 %v113_v43, %v89_v47 }
 0x10d   :  { %v73_v50 = vsub.f32 1.5, %v72_v48 }
 0x10e   :  { %v120_v51 = vpop.eup %119  ;;  %v103_v52 = vadd.f32 %v114_v46, %v96_v49 }
 0x10f   :  { %v74_v53 = vmul.f32 %v118_v39, %v73_v50  ;;  %v80_v54 = vmul.f32 %v120_v51, %v58_v40  ;;  %vm86_vm7 = vweird.f32 %v120_v51 }
 0x110   :  { %106 = vst [vmem:[%s183_s4] sm:$0xff] %v103_v52  ;;  %vm87_vm9 = vmor %vm85_vm8, %vm86_vm7 }
 0x111   :  { %v78_v55 = vsel %vm77_vm6, %v118_v39, %v74_v53  ;;  %v81_v56 = vmul.f32 %v120_v51, %v80_v54 }
 0x112   :  { %v90_v57 = vmul.f32 %v78_v55, %v42_v22 }
 0x113   :  { %v82_v58 = vmul.f32 0.5, %v81_v56 }
 0x114   :  { %v97_v59 = vmul.f32 %v113_v43, %v90_v57 }
 0x115   :  { %v83_v60 = vsub.f32 1.5, %v82_v58 }
 0x116   :  { %v104_v61 = vadd.f32 %v114_v46, %v97_v59 }
 0x117   :  { %v84_v62 = vmul.f32 %v120_v51, %v83_v60 }
 0x118   :  { %107 = vst [vmem:[%s183_s4 + $0x8] sm:$0xff] %v104_v61 }
 0x119   :  { %v88_v63 = vsel %vm87_vm9, %v120_v51, %v84_v62 }
 0x11a   :  { %v91_v0 = vmul.f32 %v88_v63, %v43_v24 }
 0x11c   :  { %v98_v1 = vmul.f32 %v113_v43, %v91_v0 }
 0x11e   :  { %v105_v2 = vadd.f32 %v114_v46, %v98_v1 }
 0x120   :  { %108 = vst [vmem:[%s183_s4 + $0x10] sm:$0xff] %v105_v2 }

// kernel: transformer_forward.42
= control target key start
LH: loop header
LB: loop body
LE: loop exit
PB: predicated region body
PF: predicated region fallthrough
CT: control target
= control target key end

     0   :  { %s334_s1 = inlined_call_operand.vmem [shape: f32[128,128], index: 1, kind: input, shape index: {}]   ;;  %s335_s3 = inlined_call_operand.vmem [shape: f32[128,128], index: 3, kind: input, shape index: {}]   ;;  %s336_s2 = inlined_call_operand.vmem [shape: f32[1,128], index: 2, kind: input, shape index: {}]   ;;  %s337_s0 = inlined_call_operand.vmem [shape: f32[24,128], index: 0, kind: input, shape index: {}]   ;;  %s338_s4 = inlined_call_operand.vmem [shape: f32[1,128], index: 4, kind: input, shape index: {}]   ;;  %s339_s5 = inlined_call_operand.vmem [shape: f32[24,128], index: 5, kind: output, shape index: {}]  }
   0x1   :  { %v45_v0 = vld [vmem:[%s334_s1 + $0x78] sm:$0xff]  ;;  %v44_v1 = vld [vmem:[%s334_s1 + $0x70] sm:$0xff]  ;;  %v43_v2 = vld [vmem:[%s334_s1 + $0x68] sm:$0xff] }
   0x2   :  { %150 = vmatpush.msra.mxu2 %v45_v0  ;;  %50 = vmatpush.msra.mxu0 %v45_v0  ;;  %v42_v3 = vld [vmem:[%s334_s1 + $0x60] sm:$0xff]  ;;  %v41_v4 = vld [vmem:[%s334_s1 + $0x58] sm:$0xff]  ;;  %v40_v5 = vld [vmem:[%s334_s1 + $0x50] sm:$0xff] }
   0x3   :  { %v97_v6 = vld [vmem:[%s335_s3 + $0x78] sm:$0xff]  ;;  %v96_v7 = vld [vmem:[%s335_s3 + $0x70] sm:$0xff]  ;;  %v39_v8 = vld [vmem:[%s334_s1 + $0x48] sm:$0xff] }
   0x4   :  { %151 = vmatpush.msra.mxu2 %v44_v1  ;;  %51 = vmatpush.msra.mxu0 %v44_v1  ;;  %v95_v9 = vld [vmem:[%s335_s3 + $0x68] sm:$0xff]  ;;  %v38_v10 = vld [vmem:[%s334_s1 + $0x40] sm:$0xff]  ;;  %v37_v12 = vld [vmem:[%s334_s1 + $0x38] sm:$0xff] }
   0x5   :  { %166 = vmatpush.msra.mxu3 %v97_v6  ;;  %98 = vmatpush.msra.mxu1 %v97_v6  ;;  %v94_v11 = vld [vmem:[%s335_s3 + $0x60] sm:$0xff]  ;;  %v93_v13 = vld [vmem:[%s335_s3 + $0x58] sm:$0xff]  ;;  %v36_v14 = vld [vmem:[%s334_s1 + $0x30] sm:$0xff] }
   0x6   :  { %152 = vmatpush.msra.mxu2 %v43_v2  ;;  %52 = vmatpush.msra.mxu0 %v43_v2  ;;  %v92_v15 = vld [vmem:[%s335_s3 + $0x50] sm:$0xff]  ;;  %v35_v16 = vld [vmem:[%s334_s1 + $0x28] sm:$0xff]  ;;  %v34_v18 = vld [vmem:[%s334_s1 + $0x20] sm:$0xff] }
   0x7   :  { %167 = vmatpush.msra.mxu3 %v96_v7  ;;  %99 = vmatpush.msra.mxu1 %v96_v7  ;;  %v91_v17 = vld [vmem:[%s335_s3 + $0x48] sm:$0xff]  ;;  %v90_v19 = vld [vmem:[%s335_s3 + $0x40] sm:$0xff]  ;;  %v33_v20 = vld [vmem:[%s334_s1 + $0x18] sm:$0xff] }
   0x8   :  { %153 = vmatpush.msra.mxu2 %v42_v3  ;;  %53 = vmatpush.msra.mxu0 %v42_v3  ;;  %v89_v21 = vld [vmem:[%s335_s3 + $0x38] sm:$0xff]  ;;  %v32_v22 = vld [vmem:[%s334_s1 + $0x10] sm:$0xff]  ;;  %v31_v24 = vld [vmem:[%s334_s1 + $0x8] sm:$0xff] }
   0x9   :  { %168 = vmatpush.msra.mxu3 %v95_v9  ;;  %100 = vmatpush.msra.mxu1 %v95_v9  ;;  %v88_v23 = vld [vmem:[%s335_s3 + $0x30] sm:$0xff]  ;;  %v87_v25 = vld [vmem:[%s335_s3 + $0x28] sm:$0xff]  ;;  %v30_v26 = vld [vmem:[%s334_s1] sm:$0xff] }
   0xa   :  { %154 = vmatpush.msra.mxu2 %v41_v4  ;;  %54 = vmatpush.msra.mxu0 %v41_v4  ;;  %v28_v27 = vld [vmem:[%s337_s0 + $0x8] sm:$0xff]  ;;  %v27_v28 = vld [vmem:[%s337_s0] sm:$0xff]  ;;  %v85_v30 = vld [vmem:[%s335_s3 + $0x18] sm:$0xff] }
   0xb   :  { %169 = vmatpush.msra.mxu3 %v94_v11  ;;  %101 = vmatpush.msra.mxu1 %v94_v11  ;;  %v86_v29 = vld [vmem:[%s335_s3 + $0x20] sm:$0xff]  ;;  %v29_v31 = vld [vmem:[%s337_s0 + $0x10] sm:$0xff]  ;;  %v83_v33 = vld [vmem:[%s335_s3 + $0x8] sm:$0xff] }
   0xc   :  { %155 = vmatpush.msra.mxu2 %v40_v5  ;;  %55 = vmatpush.msra.mxu0 %v40_v5  ;;  %v84_v32 = vld [vmem:[%s335_s3 + $0x10] sm:$0xff]  ;;  %v82_v34 = vld [vmem:[%s335_s3] sm:$0xff] }
   0xd   :  { %170 = vmatpush.msra.mxu3 %v93_v13  ;;  %102 = vmatpush.msra.mxu1 %v93_v13  ;;  %v182_v35 = vld [vmem:[%s336_s2] ss:$0 sm:$0xff] }
   0xe   :  { %156 = vmatpush.msra.mxu2 %v39_v8  ;;  %56 = vmatpush.msra.mxu0 %v39_v8  ;;  %v183_v45 = vld [vmem:[%s338_s4] ss:$0 sm:$0xff] }
   0xf   :  { %171 = vmatpush.msra.mxu3 %v92_v15  ;;  %103 = vmatpush.msra.mxu1 %v92_v15 }
  0x10   :  { %157 = vmatpush.msra.mxu2 %v38_v10  ;;  %57 = vmatpush.msra.mxu0 %v38_v10 }
  0x11   :  { %172 = vmatpush.msra.mxu3 %v91_v17  ;;  %104 = vmatpush.msra.mxu1 %v91_v17 }
  0x12   :  { %158 = vmatpush.msra.mxu2 %v37_v12  ;;  %58 = vmatpush.msra.mxu0 %v37_v12 }
  0x13   :  { %173 = vmatpush.msra.mxu3 %v90_v19  ;;  %105 = vmatpush.msra.mxu1 %v90_v19 }
  0x14   :  { %159 = vmatpush.msra.mxu2 %v36_v14  ;;  %59 = vmatpush.msra.mxu0 %v36_v14 }
  0x15   :  { %174 = vmatpush.msra.mxu3 %v89_v21  ;;  %106 = vmatpush.msra.mxu1 %v89_v21 }
  0x16   :  { %160 = vmatpush.msra.mxu2 %v35_v16  ;;  %60 = vmatpush.msra.mxu0 %v35_v16 }
  0x17   :  { %175 = vmatpush.msra.mxu3 %v88_v23  ;;  %107 = vmatpush.msra.mxu1 %v88_v23 }
  0x18   :  { %161 = vmatpush.msra.mxu2 %v34_v18  ;;  %61 = vmatpush.msra.mxu0 %v34_v18 }
  0x19   :  { %176 = vmatpush.msra.mxu3 %v87_v25  ;;  %108 = vmatpush.msra.mxu1 %v87_v25 }
  0x1a   :  { %162 = vmatpush.msra.mxu2 %v33_v20  ;;  %62 = vmatpush.msra.mxu0 %v33_v20 }
  0x1b   :  { %177 = vmatpush.msra.mxu3 %v86_v29  ;;  %109 = vmatpush.msra.mxu1 %v86_v29 }
  0x1c   :  { %163 = vmatpush.msra.mxu2 %v32_v22  ;;  %63 = vmatpush.msra.mxu0 %v32_v22 }
  0x1d   :  { %178 = vmatpush.msra.mxu3 %v85_v30  ;;  %110 = vmatpush.msra.mxu1 %v85_v30 }
  0x1e   :  { %164 = vmatpush.msra.mxu2 %v31_v24  ;;  %64 = vmatpush.msra.mxu0 %v31_v24 }
  0x1f   :  { %179 = vmatpush.msra.mxu3 %v84_v32  ;;  %111 = vmatpush.msra.mxu1 %v84_v32 }
  0x20   :  { %165 = vmatpush.msra.mxu2 %v30_v26  ;;  %65 = vmatpush.msra.mxu0 %v30_v26 }
  0x21   :  { %69 = vmatmul.f32.vlgmr.msra.gmra.mxu2 %v28_v27  ;;  %66 = vmatmul.f32.vlgmr.msra.gmra.mxu0 %v27_v28 }
  0x22   :  { %180 = vmatpush.msra.mxu3 %v83_v33  ;;  %112 = vmatpush.msra.mxu1 %v83_v33 }
  0x24   :  { %181 = vmatpush.msra.mxu3 %v82_v34  ;;  %113 = vmatpush.msra.mxu1 %v82_v34 }
  0x29   :  { %72 = vmatmul.f32.gmra.mxu2 %v29_v31 }
  0x9e   :  { %v67_v36 = vpop.f32.mrf.mxu0 }
  0x9f   :  { %v68_v37 = vadd.f32 %v182_v35, %v67_v36 }
  0xa1   :  { %v76_v38 = vmax.f32 %v68_v37, 0.0 }
  0xa3   :  { %114 = vmatmul.f32.vlgmr.msra.gmra.mxu1 %v76_v38 }
  0xa4   :  { %v70_v39 = vpop.f32.mrf.mxu2 }
  0xa5   :  { %v71_v40 = vadd.f32 %v182_v35, %v70_v39 }
  0xa7   :  { %v77_v41 = vmax.f32 %v71_v40, 0.0 }
  0xa9   :  { %117 = vmatmul.f32.vlgmr.msra.gmra.mxu3 %v77_v41 }
  0xac   :  { %v73_v42 = vpop.f32.mrf.mxu2 }
  0xad   :  { %v74_v43 = vadd.f32 %v182_v35, %v73_v42 }
  0xaf   :  { %v78_v44 = vmax.f32 %v74_v43, 0.0 }
  0xb1   :  { %120 = vmatmul.f32.gmra.mxu3 %v78_v44 }
 0x120   :  { %v115_v46 = vpop.f32.mrf.mxu1 }
 0x121   :  { %v140_v47 = vadd.f32 %v183_v45, %v115_v46 }
 0x123   :  { %143 = vst [vmem:[%s339_s5] sm:$0xff] %v140_v47 }
 0x12c   :  { %v118_v48 = vpop.f32.mrf.mxu3 }
 0x12d   :  { %v141_v49 = vadd.f32 %v183_v45, %v118_v48 }
 0x12f   :  { %144 = vst [vmem:[%s339_s5 + $0x8] sm:$0xff] %v141_v49 }
 0x134   :  { %v121_v50 = vpop.f32.mrf.mxu3 }
 0x135   :  { %v142_v51 = vadd.f32 %v183_v45, %v121_v50 }
 0x137   :  { %145 = vst [vmem:[%s339_s5 + $0x10] sm:$0xff] %v142_v51 }

// kernel: transformer_forward.60
= control target key start
LH: loop header
LB: loop body
LE: loop exit
PB: predicated region body
PF: predicated region fallthrough
CT: control target
= control target key end

     0   :  { %s313_s1 = inlined_call_operand.vmem [shape: f32[128,128], index: 1, kind: input, shape index: {}]   ;;  %s314_s3 = inlined_call_operand.vmem [shape: f32[128,128], index: 3, kind: input, shape index: {}]   ;;  %s315_s2 = inlined_call_operand.vmem [shape: f32[1,128], index: 2, kind: input, shape index: {}]   ;;  %s316_s0 = inlined_call_operand.vmem [shape: f32[16,128], index: 0, kind: input, shape index: {}]   ;;  %s317_s4 = inlined_call_operand.vmem [shape: f32[1,128], index: 4, kind: input, shape index: {}]   ;;  %s318_s5 = inlined_call_operand.vmem [shape: f32[16,128], index: 5, kind: output, shape index: {}]  }
   0x1   :  { %v43_v0 = vld [vmem:[%s313_s1 + $0x78] sm:$0xff]  ;;  %v42_v1 = vld [vmem:[%s313_s1 + $0x70] sm:$0xff]  ;;  %v41_v2 = vld [vmem:[%s313_s1 + $0x68] sm:$0xff] }
   0x2   :  { %135 = vmatpush.msra.mxu2 %v43_v0  ;;  %48 = vmatpush.msra.mxu0 %v43_v0  ;;  %v40_v3 = vld [vmem:[%s313_s1 + $0x60] sm:$0xff]  ;;  %v39_v4 = vld [vmem:[%s313_s1 + $0x58] sm:$0xff]  ;;  %v89_v6 = vld [vmem:[%s314_s3 + $0x70] sm:$0xff] }
   0x3   :  { %v90_v5 = vld [vmem:[%s314_s3 + $0x78] sm:$0xff]  ;;  %v38_v7 = vld [vmem:[%s313_s1 + $0x50] sm:$0xff]  ;;  %v88_v8 = vld [vmem:[%s314_s3 + $0x68] sm:$0xff] }
   0x4   :  { %136 = vmatpush.msra.mxu2 %v42_v1  ;;  %49 = vmatpush.msra.mxu0 %v42_v1  ;;  %v37_v9 = vld [vmem:[%s313_s1 + $0x48] sm:$0xff]  ;;  %v87_v10 = vld [vmem:[%s314_s3 + $0x60] sm:$0xff]  ;;  %v86_v12 = vld [vmem:[%s314_s3 + $0x58] sm:$0xff] }
   0x5   :  { %151 = vmatpush.msra.mxu3 %v90_v5  ;;  %91 = vmatpush.msra.mxu1 %v90_v5  ;;  %v36_v11 = vld [vmem:[%s313_s1 + $0x40] sm:$0xff]  ;;  %v35_v13 = vld [vmem:[%s313_s1 + $0x38] sm:$0xff]  ;;  %v85_v14 = vld [vmem:[%s314_s3 + $0x50] sm:$0xff] }
   0x6   :  { %137 = vmatpush.msra.mxu2 %v41_v2  ;;  %50 = vmatpush.msra.mxu0 %v41_v2  ;;  %v34_v15 = vld [vmem:[%s313_s1 + $0x30] sm:$0xff]  ;;  %v84_v16 = vld [vmem:[%s314_s3 + $0x48] sm:$0xff]  ;;  %v83_v18 = vld [vmem:[%s314_s3 + $0x40] sm:$0xff] }
   0x7   :  { %152 = vmatpush.msra.mxu3 %v89_v6  ;;  %92 = vmatpush.msra.mxu1 %v89_v6  ;;  %v33_v17 = vld [vmem:[%s313_s1 + $0x28] sm:$0xff]  ;;  %v32_v19 = vld [vmem:[%s313_s1 + $0x20] sm:$0xff]  ;;  %v82_v20 = vld [vmem:[%s314_s3 + $0x38] sm:$0xff] }
   0x8   :  { %138 = vmatpush.msra.mxu2 %v40_v3  ;;  %51 = vmatpush.msra.mxu0 %v40_v3  ;;  %v31_v21 = vld [vmem:[%s313_s1 + $0x18] sm:$0xff]  ;;  %v81_v22 = vld [vmem:[%s314_s3 + $0x30] sm:$0xff]  ;;  %v80_v24 = vld [vmem:[%s314_s3 + $0x28] sm:$0xff] }
   0x9   :  { %153 = vmatpush.msra.mxu3 %v88_v8  ;;  %93 = vmatpush.msra.mxu1 %v88_v8  ;;  %v30_v23 = vld [vmem:[%s313_s1 + $0x10] sm:$0xff]  ;;  %v29_v25 = vld [vmem:[%s313_s1 + $0x8] sm:$0xff]  ;;  %v79_v26 = vld [vmem:[%s314_s3 + $0x20] sm:$0xff] }
   0xa   :  { %139 = vmatpush.msra.mxu2 %v39_v4  ;;  %52 = vmatpush.msra.mxu0 %v39_v4  ;;  %v28_v27 = vld [vmem:[%s313_s1] sm:$0xff]  ;;  %v27_v28 = vld [vmem:[%s316_s0 + $0x8] sm:$0xff]  ;;  %v78_v30 = vld [vmem:[%s314_s3 + $0x18] sm:$0xff] }
   0xb   :  { %154 = vmatpush.msra.mxu3 %v87_v10  ;;  %94 = vmatpush.msra.mxu1 %v87_v10  ;;  %v26_v29 = vld [vmem:[%s316_s0] sm:$0xff]  ;;  %v77_v31 = vld [vmem:[%s314_s3 + $0x10] sm:$0xff]  ;;  %v76_v32 = vld [vmem:[%s314_s3 + $0x8] sm:$0xff] }
   0xc   :  { %140 = vmatpush.msra.mxu2 %v38_v7  ;;  %53 = vmatpush.msra.mxu0 %v38_v7  ;;  %v75_v33 = vld [vmem:[%s314_s3] sm:$0xff] }
   0xd   :  { %155 = vmatpush.msra.mxu3 %v86_v12  ;;  %95 = vmatpush.msra.mxu1 %v86_v12  ;;  %v167_v34 = vld [vmem:[%s315_s2] ss:$0 sm:$0xff] }
   0xe   :  { %141 = vmatpush.msra.mxu2 %v37_v9  ;;  %54 = vmatpush.msra.mxu0 %v37_v9  ;;  %v168_v41 = vld [vmem:[%s317_s4] ss:$0 sm:$0xff] }
   0xf   :  { %156 = vmatpush.msra.mxu3 %v85_v14  ;;  %96 = vmatpush.msra.mxu1 %v85_v14 }
  0x10   :  { %142 = vmatpush.msra.mxu2 %v36_v11  ;;  %55 = vmatpush.msra.mxu0 %v36_v11 }
  0x11   :  { %157 = vmatpush.msra.mxu3 %v84_v16  ;;  %97 = vmatpush.msra.mxu1 %v84_v16 }
  0x12   :  { %143 = vmatpush.msra.mxu2 %v35_v13  ;;  %56 = vmatpush.msra.mxu0 %v35_v13 }
  0x13   :  { %158 = vmatpush.msra.mxu3 %v83_v18  ;;  %98 = vmatpush.msra.mxu1 %v83_v18 }
  0x14   :  { %144 = vmatpush.msra.mxu2 %v34_v15  ;;  %57 = vmatpush.msra.mxu0 %v34_v15 }
  0x15   :  { %159 = vmatpush.msra.mxu3 %v82_v20  ;;  %99 = vmatpush.msra.mxu1 %v82_v20 }
  0x16   :  { %145 = vmatpush.msra.mxu2 %v33_v17  ;;  %58 = vmatpush.msra.mxu0 %v33_v17 }
  0x17   :  { %160 = vmatpush.msra.mxu3 %v81_v22  ;;  %100 = vmatpush.msra.mxu1 %v81_v22 }
  0x18   :  { %146 = vmatpush.msra.mxu2 %v32_v19  ;;  %59 = vmatpush.msra.mxu0 %v32_v19 }
  0x19   :  { %161 = vmatpush.msra.mxu3 %v80_v24  ;;  %101 = vmatpush.msra.mxu1 %v80_v24 }
  0x1a   :  { %147 = vmatpush.msra.mxu2 %v31_v21  ;;  %60 = vmatpush.msra.mxu0 %v31_v21 }
  0x1b   :  { %162 = vmatpush.msra.mxu3 %v79_v26  ;;  %102 = vmatpush.msra.mxu1 %v79_v26 }
  0x1c   :  { %148 = vmatpush.msra.mxu2 %v30_v23  ;;  %61 = vmatpush.msra.mxu0 %v30_v23 }
  0x1d   :  { %163 = vmatpush.msra.mxu3 %v78_v30  ;;  %103 = vmatpush.msra.mxu1 %v78_v30 }
  0x1e   :  { %149 = vmatpush.msra.mxu2 %v29_v25  ;;  %62 = vmatpush.msra.mxu0 %v29_v25 }
  0x1f   :  { %164 = vmatpush.msra.mxu3 %v77_v31  ;;  %104 = vmatpush.msra.mxu1 %v77_v31 }
  0x20   :  { %150 = vmatpush.msra.mxu2 %v28_v27  ;;  %63 = vmatpush.msra.mxu0 %v28_v27 }
  0x21   :  { %67 = vmatmul.f32.vlgmr.msra.gmra.mxu2 %v27_v28  ;;  %64 = vmatmul.f32.vlgmr.msra.gmra.mxu0 %v26_v29 }
  0x22   :  { %165 = vmatpush.msra.mxu3 %v76_v32  ;;  %105 = vmatpush.msra.mxu1 %v76_v32 }
  0x24   :  { %166 = vmatpush.msra.mxu3 %v75_v33  ;;  %106 = vmatpush.msra.mxu1 %v75_v33 }
  0x9e   :  { %v65_v35 = vpop.f32.mrf.mxu0 }
  0x9f   :  { %v66_v36 = vadd.f32 %v167_v34, %v65_v35 }
  0xa1   :  { %v71_v37 = vmax.f32 %v66_v36, 0.0 }
  0xa3   :  { %107 = vmatmul.f32.vlgmr.msra.gmra.mxu1 %v71_v37 }
  0xa4   :  { %v68_v38 = vpop.f32.mrf.mxu2 }
  0xa5   :  { %v69_v39 = vadd.f32 %v167_v34, %v68_v38 }
  0xa7   :  { %v72_v40 = vmax.f32 %v69_v39, 0.0 }
  0xa9   :  { %110 = vmatmul.f32.vlgmr.msra.gmra.mxu3 %v72_v40 }
 0x120   :  { %v108_v42 = vpop.f32.mrf.mxu1 }
 0x121   :  { %v127_v43 = vadd.f32 %v168_v41, %v108_v42 }
 0x123   :  { %129 = vst [vmem:[%s318_s5] sm:$0xff] %v127_v43 }
 0x12c   :  { %v111_v44 = vpop.f32.mrf.mxu3 }
 0x12d   :  { %v128_v45 = vadd.f32 %v168_v41, %v111_v44 }
 0x12f   :  { %130 = vst [vmem:[%s318_s5 + $0x8] sm:$0xff] %v128_v45 }

</bundles_post_ra>
